<compile_context>
chip_gen: v7x
topology: tpu7x:2x2x1
jax: 0.10.0
libtpu: 0.0.40
codegen_flags: <defaults>
</compile_context>

<pallas_src>
import functools

import jax
import jax.numpy as jnp
import numpy as np
from jax.experimental import pallas as pl
from jax.experimental.pallas import tpu as pltpu

_EPS = 1e-5  # nn.BatchNorm2d default eps


def _is_pow2(n):
    return n > 0 and (n & (n - 1)) == 0


def _vmem_limit_bytes():
    """~75% of physical VMEM: ~96 MiB on v5e/v6e (128 MiB), ~48 MiB on v7x."""
    default = 48 * 1024 * 1024
    try:
        cap = getattr(pltpu.get_tpu_info(), "vmem_capacity_bytes", None)
    except Exception:
        cap = None
    if not cap:
        return default
    return int(cap) * 3 // 4


def _skip_branch_kernel(x_ref, w1_ref, w2_ref, g_ref, bt_ref, out_ref,
                        patch_ref, *, height, width):
    """One residual branch of Skip_class, channels-on-sublanes layout.

    x_ref    : (Cin, M) f32   branch input, M = N*H*W on the lane axis
    w1_ref   : (C, 9*Cin) bf16 conv1 weights, K ordered (ky, kx, cin)
    w2_ref   : (C, 9*C)  bf16 conv2 weights
    g_ref    : (C, 1) f32     batchnorm gamma
    bt_ref   : (C, 1) f32     batchnorm beta
    out_ref  : (C, M)         lane-dense output slab
    patch_ref: (9*max(Cin,C), M) bf16 VMEM scratch for im2col patches
    """
    Cin, M = x_ref.shape
    C = out_ref.shape[0]
    H, W = height, width

    gamma = g_ref[...]                       # (C, 1)
    beta = bt_ref[...]                       # (C, 1)

    # ---- 3x3 'same' boundary masks, generated in-kernel (no HBM mask input).
    m = jax.lax.broadcasted_iota(jnp.int32, (1, M), 1)
    if _is_pow2(W):
        col = m & (W - 1)
        mrow = m >> (int(W).bit_length() - 1)
    else:
        # TODO(synk): int-vector div/rem path only taken for non-pow2 W.
        col = m % W
        mrow = m // W
    row = (mrow & (H - 1)) if _is_pow2(H) else (mrow % H)

    up_ok = row >= 1          # tap dy = -1 in bounds
    dn_ok = row < H - 1       # tap dy = +1 in bounds
    lf_ok = col >= 1          # tap dx = -1 in bounds
    rt_ok = col < W - 1       # tap dx = +1 in bounds

    def _tap_mask(dy, dx):
        conds = []
        if dy < 0:
            conds.append(up_ok)
        if dy > 0:
            conds.append(dn_ok)
        if dx < 0:
            conds.append(lf_ok)
        if dx > 0:
            conds.append(rt_ok)
        if not conds:
            return None                      # centre tap: always valid
        ok = conds[0]
        for c in conds[1:]:
            ok = ok & c
        return ok.astype(jnp.float32)        # (1, M) {0, 1}

    tap_masks = [_tap_mask(ky - 1, kx - 1) for ky in range(3) for kx in range(3)]

    def conv3x3(a, w_bf16):
        """a: (K0, M) f32 -> (C, M) f32.  One MXU matmul over an im2col patch
        matrix built with lane rolls + boundary masks; each tap is cast to
        bf16 at the write into the VMEM scratch (no f32 concat intermediate).
        The conv bias is dropped: a per-channel constant cancels exactly in
        the batch-statistic BatchNorm that follows."""
        K0 = a.shape[0]
        k = 0
        for ky in range(3):
            for kx in range(3):
                off = (ky - 1) * W + (kx - 1)        # flat offset of this tap
                if off == 0:
                    tap = a
                else:
                    # out[m] = a[m + off], masked where zero padding is read
                    tap = pltpu.roll(a, (-off) % M, 1) * tap_masks[k]
                patch_ref[k * K0:(k + 1) * K0, :] = tap.astype(jnp.bfloat16)
                k += 1
        return jnp.dot(w_bf16, patch_ref[0:9 * K0, :],
                       preferred_element_type=jnp.float32)

    def batch_norm(h):
        # Two-pass batch statistics (robust); gamma folded into one scale.
        inv_m = 1.0 / M
        mu = jnp.sum(h, axis=1, keepdims=True) * inv_m
        d = h - mu
        var = jnp.sum(d * d, axis=1, keepdims=True) * inv_m
        scale = gamma * jax.lax.rsqrt(var + _EPS)    # EUP rsqrt
        return d * scale + beta

    xf = x_ref[...]                                  # (Cin, M) f32

    h = jnp.maximum(batch_norm(conv3x3(xf, w1_ref[...])), 0.0)
    h2 = batch_norm(conv3x3(h, w2_ref[...]))

    # Residual: identity tiled int(out_ch/in_ch) times along the channel axis,
    # added per channel-slice at the store (no concat / zeros materialization).
    rep = C // Cin
    for r in range(rep):
        out_ref[r * Cin:(r + 1) * Cin, :] = (
            h2[r * Cin:(r + 1) * Cin, :] + xf).astype(out_ref.dtype)
    if rep * Cin < C:
        out_ref[rep * Cin:, :] = h2[rep * Cin:, :].astype(out_ref.dtype)


def skip_class_forward(x_nchw, w1, b1, w2, b2, gamma, beta,
                       pool_enable=False, out_dtype=jnp.float32):
    """Pallas implementation of Skip_class.forward.

    x_nchw: (N, in_ch, H, W); conv weights in HWIO (3, 3, cin, cout).
    b1/b2 are accepted for API parity but unused: a per-channel bias cancels
    exactly in the batch-statistic BatchNorm that follows each conv.
    Pass out_dtype=jnp.bfloat16 if the consumer accepts bf16 activations
    (halves the dominant output HBM stream).
    """
    del b1, b2
    assert not pool_enable  # TODO(synk): MaxPool2d(2,2) path not implemented.
    N, in_ch, H, W = x_nchw.shape
    Cin = in_ch // 2
    C = w1.shape[-1]          # out_ch // 2
    M = N * H * W
    assert M % 128 == 0, "N*H*W must be a multiple of 128 for lane-dense stores"

    # Host glue (layout plumbing only): NCHW -> (branch, Cin, N*H*W).  Kept in
    # f32 so the residual identity matches PyTorch exactly; conv taps are cast
    # to bf16 inside the kernel.
    xb = (x_nchw.astype(jnp.float32)
          .reshape(N, 2, Cin, H, W)
          .transpose(1, 2, 0, 3, 4)
          .reshape(2, Cin, M))

    # Conv weights -> (C_out, 9*C_in) with K ordered (ky, kx, cin), bf16.
    w1r = w1.reshape(9 * Cin, C).T.astype(jnp.bfloat16)
    w2r = w2.reshape(9 * C, C).T.astype(jnp.bfloat16)
    g_r = gamma.reshape(C, 1).astype(jnp.float32)
    bt_r = beta.reshape(C, 1).astype(jnp.float32)

    kernel = functools.partial(_skip_branch_kernel, height=H, width=W)

    out = pl.pallas_call(
        kernel,
        out_shape=jax.ShapeDtypeStruct((2, C, M), out_dtype),
        grid_spec=pltpu.PrefetchScalarGridSpec(
            num_scalar_prefetch=0,
            grid=(2,),  # one grid step per residual branch (per-branch BN stats)
            in_specs=[
                pl.BlockSpec((None, Cin, M), lambda b: (b, 0, 0)),
                pl.BlockSpec((C, 9 * Cin), lambda b: (0, 0)),
                pl.BlockSpec((C, 9 * C), lambda b: (0, 0)),
                pl.BlockSpec((C, 1), lambda b: (0, 0)),
                pl.BlockSpec((C, 1), lambda b: (0, 0)),
            ],
            out_specs=pl.BlockSpec((None, C, M), lambda b: (b, 0, 0)),
            scratch_shapes=[
                pltpu.VMEM((9 * max(Cin, C), M), jnp.bfloat16),  # im2col patches
            ],
        ),
        compiler_params=pltpu.CompilerParams(
            # Branches are independent -> one per TensorCore on v7x.
            dimension_semantics=("parallel",),
            vmem_limit_bytes=_vmem_limit_bytes(),
        ),
    )(xb, w1r, w2r, g_r, bt_r)

    # Host glue: (branch, C, N*H*W) -> (N, out_ch, H, W), branch-0 channels first.
    return (out.reshape(2, C, N, H, W)
            .transpose(2, 0, 1, 3, 4)
            .reshape(N, 2 * C, H, W))


# ------------------------- pure-JAX reference -------------------------------
def _reference(x_nchw, w1, b1, w2, b2, gamma, beta):
    """Reference mirroring the kernel's precision: conv inputs/weights bf16
    with f32 accumulation, BatchNorm/elementwise/residual in f32.  Biases are
    included here (they cancel in the batch-stat BN, which is why the kernel
    legitimately omits them)."""
    Cin = x_nchw.shape[1] // 2
    C = w1.shape[-1]

    def conv3x3(x, w, b):
        y = jax.lax.conv_general_dilated(
            x.astype(jnp.bfloat16), w.astype(jnp.bfloat16),
            window_strides=(1, 1), padding="SAME",
            dimension_numbers=("NHWC", "HWIO", "NHWC"),
            preferred_element_type=jnp.float32)
        return y + b.astype(jnp.float32)

    def bn(h):
        mu = h.mean(axis=(0, 1, 2), keepdims=True)
        var = ((h - mu) ** 2).mean(axis=(0, 1, 2), keepdims=True)
        return (h - mu) * jax.lax.rsqrt(var + _EPS) * gamma + beta

    def branch(xh):
        h = jnp.maximum(bn(conv3x3(xh, w1, b1)), 0.0)
        h = bn(conv3x3(h, w2, b2))
        rep = C // Cin
        parts = [xh] * rep
        if rep * Cin < C:
            parts.append(jnp.zeros(xh.shape[:-1] + (C - rep * Cin,), jnp.float32))
        return h + jnp.concatenate(parts, axis=-1)

    x_nhwc = jnp.transpose(x_nchw, (0, 2, 3, 1)).astype(jnp.float32)
    o1 = branch(x_nhwc[..., :Cin])
    o2 = branch(x_nhwc[..., Cin:])
    return jnp.transpose(jnp.concatenate([o1, o2], axis=-1), (0, 3, 1, 2))


if __name__ == "__main__":
    # Skip_class(in_ch=4, out_ch=8, pool_enable=False); x: (N=2, 4, 16, 16)
    in_ch, out_ch = 4, 8
    N, H, W = 2, 16, 16
    Cin, C = in_ch // 2, out_ch // 2

    key = jax.random.PRNGKey(0)
    kx, k1, k2, k3, k4, k5, k6 = jax.random.split(key, 7)
    x = jax.random.normal(kx, (N, in_ch, H, W), jnp.float32)

    # deterministic synthetic parameters (HWIO conv weights)
    w1 = 0.2 * jax.random.normal(k1, (3, 3, Cin, C), jnp.float32)
    b1 = 0.1 * jax.random.normal(k2, (C,), jnp.float32)
    w2 = 0.2 * jax.random.normal(k3, (3, 3, C, C), jnp.float32)
    b2 = 0.1 * jax.random.normal(k4, (C,), jnp.float32)
    gamma = 1.0 + 0.1 * jax.random.normal(k5, (C,), jnp.float32)
    beta = 0.1 * jax.random.normal(k6, (C,), jnp.float32)

    out = skip_class_forward(x, w1, b1, w2, b2, gamma, beta)
    out = jax.block_until_ready(out)

    ref = _reference(x, w1, b1, w2, b2, gamma, beta)
    err = float(np.max(np.abs(np.asarray(out) - np.asarray(ref))))
    assert out.shape == (N, out_ch, H, W), out.shape
    # Tolerance covers bf16 matmul inputs (f32 accumulation), accumulation-order
    # differences vs the XLA conv reference, and the (exactly-cancelling) bias.
    assert err < 2e-2, f"max abs error too large: {err}"
    print("KERNEL_OK")
</pallas_src>

<mosaic_0001>
module attributes {stable_mosaic.version = 11 : i64} {
  func.func @_skip_branch_kernel(%arg0: i32, %arg1: memref<1x2x512xf32, #tpu.memory_space<vmem>>, %arg2: memref<4x18xbf16, #tpu.memory_space<vmem>>, %arg3: memref<4x36xbf16, #tpu.memory_space<vmem>>, %arg4: memref<4x1xf32, #tpu.memory_space<vmem>>, %arg5: memref<4x1xf32, #tpu.memory_space<vmem>>, %arg6: memref<1x4x512xf32, #tpu.memory_space<vmem>>, %arg7: memref<36x512xbf16, #tpu.memory_space<vmem>>) attributes {dimension_semantics = [#tpu.dimension_semantics<parallel>], iteration_bounds = array<i64: 2>, scalar_prefetch = 0 : i64, scratch_operands = 1 : i64, tpu.core_type = #tpu.core_type<tc>, window_params = [{transform_indices = @transform_0, window_bounds = array<i64: 1, 2, 512>}, {pipeline_mode = #tpu.pipeline_mode<synchronous>, transform_indices = @transform_1, window_bounds = array<i64: 4, 18>}, {pipeline_mode = #tpu.pipeline_mode<synchronous>, transform_indices = @transform_2, window_bounds = array<i64: 4, 36>}, {pipeline_mode = #tpu.pipeline_mode<synchronous>, transform_indices = @transform_3, window_bounds = array<i64: 4, 1>}, {pipeline_mode = #tpu.pipeline_mode<synchronous>, transform_indices = @transform_4, window_bounds = array<i64: 4, 1>}, {transform_indices = @transform_5, window_bounds = array<i64: 1, 4, 512>}]} {
    %c0 = arith.constant 0 : index
    %c0_0 = arith.constant 0 : index
    %0 = vector.load %arg4[%c0, %c0_0] : memref<4x1xf32, #tpu.memory_space<vmem>>, vector<4x1xf32>
    %c0_1 = arith.constant 0 : index
    %c0_2 = arith.constant 0 : index
    %1 = vector.load %arg5[%c0_1, %c0_2] : memref<4x1xf32, #tpu.memory_space<vmem>>, vector<4x1xf32>
    %2 = tpu.iota {dimensions = array<i32: 1>} : vector<1x512xi32>
    %c15_i32 = arith.constant 15 : i32
    %3 = vector.broadcast %c15_i32 : i32 to vector<1x512xi32>
    %4 = arith.andi %2, %3 : vector<1x512xi32>
    %c4_i32 = arith.constant 4 : i32
    %5 = vector.broadcast %c4_i32 : i32 to vector<1x512xi32>
    %6 = arith.shrsi %2, %5 : vector<1x512xi32>
    %c15_i32_3 = arith.constant 15 : i32
    %7 = vector.broadcast %c15_i32_3 : i32 to vector<1x512xi32>
    %8 = arith.andi %6, %7 : vector<1x512xi32>
    %c1_i32 = arith.constant 1 : i32
    %9 = vector.broadcast %c1_i32 : i32 to vector<1x512xi32>
    %10 = arith.cmpi sge, %8, %9 : vector<1x512xi32>
    %c15_i32_4 = arith.constant 15 : i32
    %11 = vector.broadcast %c15_i32_4 : i32 to vector<1x512xi32>
    %12 = arith.cmpi slt, %8, %11 : vector<1x512xi32>
    %c1_i32_5 = arith.constant 1 : i32
    %13 = vector.broadcast %c1_i32_5 : i32 to vector<1x512xi32>
    %14 = arith.cmpi sge, %4, %13 : vector<1x512xi32>
    %c15_i32_6 = arith.constant 15 : i32
    %15 = vector.broadcast %c15_i32_6 : i32 to vector<1x512xi32>
    %16 = arith.cmpi slt, %4, %15 : vector<1x512xi32>
    %17 = arith.andi %10, %14 : vector<1x512xi1>
    %18 = arith.extui %17 : vector<1x512xi1> to vector<1x512xi32>
    %19 = arith.sitofp %18 : vector<1x512xi32> to vector<1x512xf32>
    %20 = arith.extui %10 : vector<1x512xi1> to vector<1x512xi32>
    %21 = arith.sitofp %20 : vector<1x512xi32> to vector<1x512xf32>
    %22 = arith.andi %10, %16 : vector<1x512xi1>
    %23 = arith.extui %22 : vector<1x512xi1> to vector<1x512xi32>
    %24 = arith.sitofp %23 : vector<1x512xi32> to vector<1x512xf32>
    %25 = arith.extui %14 : vector<1x512xi1> to vector<1x512xi32>
    %26 = arith.sitofp %25 : vector<1x512xi32> to vector<1x512xf32>
    %27 = arith.extui %16 : vector<1x512xi1> to vector<1x512xi32>
    %28 = arith.sitofp %27 : vector<1x512xi32> to vector<1x512xf32>
    %29 = arith.andi %12, %14 : vector<1x512xi1>
    %30 = arith.extui %29 : vector<1x512xi1> to vector<1x512xi32>
    %31 = arith.sitofp %30 : vector<1x512xi32> to vector<1x512xf32>
    %32 = arith.extui %12 : vector<1x512xi1> to vector<1x512xi32>
    %33 = arith.sitofp %32 : vector<1x512xi32> to vector<1x512xf32>
    %34 = arith.andi %12, %16 : vector<1x512xi1>
    %35 = arith.extui %34 : vector<1x512xi1> to vector<1x512xi32>
    %36 = arith.sitofp %35 : vector<1x512xi32> to vector<1x512xf32>
    %c0_7 = arith.constant 0 : index
    %c0_8 = arith.constant 0 : index
    %c0_9 = arith.constant 0 : index
    %37 = vector.load %arg1[%c0_7, %c0_8, %c0_9] : memref<1x2x512xf32, #tpu.memory_space<vmem>>, vector<1x2x512xf32>
    %38 = vector.shape_cast %37 : vector<1x2x512xf32> to vector<2x512xf32>
    %c0_10 = arith.constant 0 : index
    %c0_11 = arith.constant 0 : index
    %39 = vector.load %arg2[%c0_10, %c0_11] : memref<4x18xbf16, #tpu.memory_space<vmem>>, vector<4x18xbf16>
    %c17_i32 = arith.constant 17 : i32
    %40 = tpu.dynamic_rotate %38 by %c17_i32 dim 1 : vector<2x512xf32>, i32 -> vector<2x512xf32>
    %41 = vector.broadcast %19 : vector<1x512xf32> to vector<2x512xf32>
    %42 = arith.mulf %40, %41 : vector<2x512xf32>
    %43 = arith.truncf %42 : vector<2x512xf32> to vector<2x512xbf16>
    %c0_12 = arith.constant 0 : index
    %c0_13 = arith.constant 0 : index
    %44 = vector.load %arg7[%c0_12, %c0_13] : memref<36x512xbf16, #tpu.memory_space<vmem>>, vector<2x512xbf16>
    tpu.vector_store %arg7[%c0_12, %c0_13], %43 {strides = array<i32>} : memref<36x512xbf16, #tpu.memory_space<vmem>>, vector<2x512xbf16>,
    %c16_i32 = arith.constant 16 : i32
    %45 = tpu.dynamic_rotate %38 by %c16_i32 dim 1 : vector<2x512xf32>, i32 -> vector<2x512xf32>
    %46 = vector.broadcast %21 : vector<1x512xf32> to vector<2x512xf32>
    %47 = arith.mulf %45, %46 : vector<2x512xf32>
    %48 = arith.truncf %47 : vector<2x512xf32> to vector<2x512xbf16>
    %c2 = arith.constant 2 : index
    %c0_14 = arith.constant 0 : index
    %49 = vector.load %arg7[%c2, %c0_14] : memref<36x512xbf16, #tpu.memory_space<vmem>>, vector<2x512xbf16>
    tpu.vector_store %arg7[%c2, %c0_14], %48 {strides = array<i32>} : memref<36x512xbf16, #tpu.memory_space<vmem>>, vector<2x512xbf16>,
    %c15_i32_15 = arith.constant 15 : i32
    %50 = tpu.dynamic_rotate %38 by %c15_i32_15 dim 1 : vector<2x512xf32>, i32 -> vector<2x512xf32>
    %51 = vector.broadcast %24 : vector<1x512xf32> to vector<2x512xf32>
    %52 = arith.mulf %50, %51 : vector<2x512xf32>
    %53 = arith.truncf %52 : vector<2x512xf32> to vector<2x512xbf16>
    %c4 = arith.constant 4 : index
    %c0_16 = arith.constant 0 : index
    %54 = vector.load %arg7[%c4, %c0_16] : memref<36x512xbf16, #tpu.memory_space<vmem>>, vector<2x512xbf16>
    tpu.vector_store %arg7[%c4, %c0_16], %53 {strides = array<i32>} : memref<36x512xbf16, #tpu.memory_space<vmem>>, vector<2x512xbf16>,
    %c1_i32_17 = arith.constant 1 : i32
    %55 = tpu.dynamic_rotate %38 by %c1_i32_17 dim 1 : vector<2x512xf32>, i32 -> vector<2x512xf32>
    %56 = vector.broadcast %26 : vector<1x512xf32> to vector<2x512xf32>
    %57 = arith.mulf %55, %56 : vector<2x512xf32>
    %58 = arith.truncf %57 : vector<2x512xf32> to vector<2x512xbf16>
    %c6 = arith.constant 6 : index
    %c0_18 = arith.constant 0 : index
    %59 = vector.load %arg7[%c6, %c0_18] : memref<36x512xbf16, #tpu.memory_space<vmem>>, vector<2x512xbf16>
    tpu.vector_store %arg7[%c6, %c0_18], %58 {strides = array<i32>} : memref<36x512xbf16, #tpu.memory_space<vmem>>, vector<2x512xbf16>,
    %60 = arith.truncf %38 : vector<2x512xf32> to vector<2x512xbf16>
    %c8 = arith.constant 8 : index
    %c0_19 = arith.constant 0 : index
    %61 = vector.load %arg7[%c8, %c0_19] : memref<36x512xbf16, #tpu.memory_space<vmem>>, vector<2x512xbf16>
    tpu.vector_store %arg7[%c8, %c0_19], %60 {strides = array<i32>} : memref<36x512xbf16, #tpu.memory_space<vmem>>, vector<2x512xbf16>,
    %c511_i32 = arith.constant 511 : i32
    %62 = tpu.dynamic_rotate %38 by %c511_i32 dim 1 : vector<2x512xf32>, i32 -> vector<2x512xf32>
    %63 = vector.broadcast %28 : vector<1x512xf32> to vector<2x512xf32>
    %64 = arith.mulf %62, %63 : vector<2x512xf32>
    %65 = arith.truncf %64 : vector<2x512xf32> to vector<2x512xbf16>
    %c10 = arith.constant 10 : index
    %c0_20 = arith.constant 0 : index
    %66 = vector.load %arg7[%c10, %c0_20] : memref<36x512xbf16, #tpu.memory_space<vmem>>, vector<2x512xbf16>
    tpu.vector_store %arg7[%c10, %c0_20], %65 {strides = array<i32>} : memref<36x512xbf16, #tpu.memory_space<vmem>>, vector<2x512xbf16>,
    %c497_i32 = arith.constant 497 : i32
    %67 = tpu.dynamic_rotate %38 by %c497_i32 dim 1 : vector<2x512xf32>, i32 -> vector<2x512xf32>
    %68 = vector.broadcast %31 : vector<1x512xf32> to vector<2x512xf32>
    %69 = arith.mulf %67, %68 : vector<2x512xf32>
    %70 = arith.truncf %69 : vector<2x512xf32> to vector<2x512xbf16>
    %c12 = arith.constant 12 : index
    %c0_21 = arith.constant 0 : index
    %71 = vector.load %arg7[%c12, %c0_21] : memref<36x512xbf16, #tpu.memory_space<vmem>>, vector<2x512xbf16>
    tpu.vector_store %arg7[%c12, %c0_21], %70 {strides = array<i32>} : memref<36x512xbf16, #tpu.memory_space<vmem>>, vector<2x512xbf16>,
    %c496_i32 = arith.constant 496 : i32
    %72 = tpu.dynamic_rotate %38 by %c496_i32 dim 1 : vector<2x512xf32>, i32 -> vector<2x512xf32>
    %73 = vector.broadcast %33 : vector<1x512xf32> to vector<2x512xf32>
    %74 = arith.mulf %72, %73 : vector<2x512xf32>
    %75 = arith.truncf %74 : vector<2x512xf32> to vector<2x512xbf16>
    %c14 = arith.constant 14 : index
    %c0_22 = arith.constant 0 : index
    %76 = vector.load %arg7[%c14, %c0_22] : memref<36x512xbf16, #tpu.memory_space<vmem>>, vector<2x512xbf16>
    tpu.vector_store %arg7[%c14, %c0_22], %75 {strides = array<i32>} : memref<36x512xbf16, #tpu.memory_space<vmem>>, vector<2x512xbf16>,
    %c495_i32 = arith.constant 495 : i32
    %77 = tpu.dynamic_rotate %38 by %c495_i32 dim 1 : vector<2x512xf32>, i32 -> vector<2x512xf32>
    %78 = vector.broadcast %36 : vector<1x512xf32> to vector<2x512xf32>
    %79 = arith.mulf %77, %78 : vector<2x512xf32>
    %80 = arith.truncf %79 : vector<2x512xf32> to vector<2x512xbf16>
    %c16 = arith.constant 16 : index
    %c0_23 = arith.constant 0 : index
    %81 = vector.load %arg7[%c16, %c0_23] : memref<36x512xbf16, #tpu.memory_space<vmem>>, vector<2x512xbf16>
    tpu.vector_store %arg7[%c16, %c0_23], %80 {strides = array<i32>} : memref<36x512xbf16, #tpu.memory_space<vmem>>, vector<2x512xbf16>,
    %c0_24 = arith.constant 0 : index
    %c0_25 = arith.constant 0 : index
    %82 = vector.load %arg7[%c0_24, %c0_25] : memref<36x512xbf16, #tpu.memory_space<vmem>>, vector<18x512xbf16>
    %cst = arith.constant dense<0.000000e+00> : vector<4x512xf32>
    %83 = tpu.matmul %39, %82, %cst {dimension_numbers = #tpu.dot_dimension_numbers<[1], [0], [0], [1], [0, 0, 1, 1], [], []>} : vector<4x18xbf16>, vector<18x512xbf16>, vector<4x512xf32> -> vector<4x512xf32>
    %cst_26 = arith.constant dense<0.000000e+00> : vector<4xf32>
    %84 = vector.multi_reduction <add>, %83, %cst_26 [1] : vector<4x512xf32> to vector<4xf32>
    %85 = vector.shape_cast %84 : vector<4xf32> to vector<4x1xf32>
    %cst_27 = arith.constant 0.001953125 : f32
    %86 = vector.broadcast %cst_27 : f32 to vector<4x1xf32>
    %87 = arith.mulf %85, %86 : vector<4x1xf32>
    %88 = vector.broadcast %87 : vector<4x1xf32> to vector<4x512xf32>
    %89 = arith.subf %83, %88 : vector<4x512xf32>
    %90 = arith.mulf %89, %89 : vector<4x512xf32>
    %cst_28 = arith.constant dense<0.000000e+00> : vector<4xf32>
    %91 = vector.multi_reduction <add>, %90, %cst_28 [1] : vector<4x512xf32> to vector<4xf32>
    %92 = vector.shape_cast %91 : vector<4xf32> to vector<4x1xf32>
    %cst_29 = arith.constant 0.001953125 : f32
    %93 = vector.broadcast %cst_29 : f32 to vector<4x1xf32>
    %94 = arith.mulf %92, %93 : vector<4x1xf32>
    %cst_30 = arith.constant 9.99999974E-6 : f32
    %95 = vector.broadcast %cst_30 : f32 to vector<4x1xf32>
    %96 = arith.addf %94, %95 : vector<4x1xf32>
    %97 = math.rsqrt %96 : vector<4x1xf32>
    %98 = arith.mulf %0, %97 : vector<4x1xf32>
    %99 = vector.broadcast %98 : vector<4x1xf32> to vector<4x512xf32>
    %100 = arith.mulf %89, %99 : vector<4x512xf32>
    %101 = vector.broadcast %1 : vector<4x1xf32> to vector<4x512xf32>
    %102 = arith.addf %100, %101 : vector<4x512xf32>
    %cst_31 = arith.constant 0.000000e+00 : f32
    %103 = vector.broadcast %cst_31 : f32 to vector<4x512xf32>
    %104 = arith.maximumf %102, %103 : vector<4x512xf32>
    %c0_32 = arith.constant 0 : index
    %c0_33 = arith.constant 0 : index
    %105 = vector.load %arg3[%c0_32, %c0_33] : memref<4x36xbf16, #tpu.memory_space<vmem>>, vector<4x36xbf16>
    %c17_i32_34 = arith.constant 17 : i32
    %106 = tpu.dynamic_rotate %104 by %c17_i32_34 dim 1 : vector<4x512xf32>, i32 -> vector<4x512xf32>
    %107 = vector.broadcast %19 : vector<1x512xf32> to vector<4x512xf32>
    %108 = arith.mulf %106, %107 : vector<4x512xf32>
    %109 = arith.truncf %108 : vector<4x512xf32> to vector<4x512xbf16>
    %c0_35 = arith.constant 0 : index
    %c0_36 = arith.constant 0 : index
    %110 = vector.load %arg7[%c0_35, %c0_36] : memref<36x512xbf16, #tpu.memory_space<vmem>>, vector<4x512xbf16>
    tpu.vector_store %arg7[%c0_35, %c0_36], %109 {strides = array<i32>} : memref<36x512xbf16, #tpu.memory_space<vmem>>, vector<4x512xbf16>,
    %c16_i32_37 = arith.constant 16 : i32
    %111 = tpu.dynamic_rotate %104 by %c16_i32_37 dim 1 : vector<4x512xf32>, i32 -> vector<4x512xf32>
    %112 = vector.broadcast %21 : vector<1x512xf32> to vector<4x512xf32>
    %113 = arith.mulf %111, %112 : vector<4x512xf32>
    %114 = arith.truncf %113 : vector<4x512xf32> to vector<4x512xbf16>
    %c4_38 = arith.constant 4 : index
    %c0_39 = arith.constant 0 : index
    %115 = vector.load %arg7[%c4_38, %c0_39] : memref<36x512xbf16, #tpu.memory_space<vmem>>, vector<4x512xbf16>
    tpu.vector_store %arg7[%c4_38, %c0_39], %114 {strides = array<i32>} : memref<36x512xbf16, #tpu.memory_space<vmem>>, vector<4x512xbf16>,
    %c15_i32_40 = arith.constant 15 : i32
    %116 = tpu.dynamic_rotate %104 by %c15_i32_40 dim 1 : vector<4x512xf32>, i32 -> vector<4x512xf32>
    %117 = vector.broadcast %24 : vector<1x512xf32> to vector<4x512xf32>
    %118 = arith.mulf %116, %117 : vector<4x512xf32>
    %119 = arith.truncf %118 : vector<4x512xf32> to vector<4x512xbf16>
    %c8_41 = arith.constant 8 : index
    %c0_42 = arith.constant 0 : index
    %120 = vector.load %arg7[%c8_41, %c0_42] : memref<36x512xbf16, #tpu.memory_space<vmem>>, vector<4x512xbf16>
    tpu.vector_store %arg7[%c8_41, %c0_42], %119 {strides = array<i32>} : memref<36x512xbf16, #tpu.memory_space<vmem>>, vector<4x512xbf16>,
    %c1_i32_43 = arith.constant 1 : i32
    %121 = tpu.dynamic_rotate %104 by %c1_i32_43 dim 1 : vector<4x512xf32>, i32 -> vector<4x512xf32>
    %122 = vector.broadcast %26 : vector<1x512xf32> to vector<4x512xf32>
    %123 = arith.mulf %121, %122 : vector<4x512xf32>
    %124 = arith.truncf %123 : vector<4x512xf32> to vector<4x512xbf16>
    %c12_44 = arith.constant 12 : index
    %c0_45 = arith.constant 0 : index
    %125 = vector.load %arg7[%c12_44, %c0_45] : memref<36x512xbf16, #tpu.memory_space<vmem>>, vector<4x512xbf16>
    tpu.vector_store %arg7[%c12_44, %c0_45], %124 {strides = array<i32>} : memref<36x512xbf16, #tpu.memory_space<vmem>>, vector<4x512xbf16>,
    %126 = arith.truncf %104 : vector<4x512xf32> to vector<4x512xbf16>
    %c16_46 = arith.constant 16 : index
    %c0_47 = arith.constant 0 : index
    %127 = vector.load %arg7[%c16_46, %c0_47] : memref<36x512xbf16, #tpu.memory_space<vmem>>, vector<4x512xbf16>
    tpu.vector_store %arg7[%c16_46, %c0_47], %126 {strides = array<i32>} : memref<36x512xbf16, #tpu.memory_space<vmem>>, vector<4x512xbf16>,
    %c511_i32_48 = arith.constant 511 : i32
    %128 = tpu.dynamic_rotate %104 by %c511_i32_48 dim 1 : vector<4x512xf32>, i32 -> vector<4x512xf32>
    %129 = vector.broadcast %28 : vector<1x512xf32> to vector<4x512xf32>
    %130 = arith.mulf %128, %129 : vector<4x512xf32>
    %131 = arith.truncf %130 : vector<4x512xf32> to vector<4x512xbf16>
    %c20 = arith.constant 20 : index
    %c0_49 = arith.constant 0 : index
    %132 = vector.load %arg7[%c20, %c0_49] : memref<36x512xbf16, #tpu.memory_space<vmem>>, vector<4x512xbf16>
    tpu.vector_store %arg7[%c20, %c0_49], %131 {strides = array<i32>} : memref<36x512xbf16, #tpu.memory_space<vmem>>, vector<4x512xbf16>,
    %c497_i32_50 = arith.constant 497 : i32
    %133 = tpu.dynamic_rotate %104 by %c497_i32_50 dim 1 : vector<4x512xf32>, i32 -> vector<4x512xf32>
    %134 = vector.broadcast %31 : vector<1x512xf32> to vector<4x512xf32>
    %135 = arith.mulf %133, %134 : vector<4x512xf32>
    %136 = arith.truncf %135 : vector<4x512xf32> to vector<4x512xbf16>
    %c24 = arith.constant 24 : index
    %c0_51 = arith.constant 0 : index
    %137 = vector.load %arg7[%c24, %c0_51] : memref<36x512xbf16, #tpu.memory_space<vmem>>, vector<4x512xbf16>
    tpu.vector_store %arg7[%c24, %c0_51], %136 {strides = array<i32>} : memref<36x512xbf16, #tpu.memory_space<vmem>>, vector<4x512xbf16>,
    %c496_i32_52 = arith.constant 496 : i32
    %138 = tpu.dynamic_rotate %104 by %c496_i32_52 dim 1 : vector<4x512xf32>, i32 -> vector<4x512xf32>
    %139 = vector.broadcast %33 : vector<1x512xf32> to vector<4x512xf32>
    %140 = arith.mulf %138, %139 : vector<4x512xf32>
    %141 = arith.truncf %140 : vector<4x512xf32> to vector<4x512xbf16>
    %c28 = arith.constant 28 : index
    %c0_53 = arith.constant 0 : index
    %142 = vector.load %arg7[%c28, %c0_53] : memref<36x512xbf16, #tpu.memory_space<vmem>>, vector<4x512xbf16>
    tpu.vector_store %arg7[%c28, %c0_53], %141 {strides = array<i32>} : memref<36x512xbf16, #tpu.memory_space<vmem>>, vector<4x512xbf16>,
    %c495_i32_54 = arith.constant 495 : i32
    %143 = tpu.dynamic_rotate %104 by %c495_i32_54 dim 1 : vector<4x512xf32>, i32 -> vector<4x512xf32>
    %144 = vector.broadcast %36 : vector<1x512xf32> to vector<4x512xf32>
    %145 = arith.mulf %143, %144 : vector<4x512xf32>
    %146 = arith.truncf %145 : vector<4x512xf32> to vector<4x512xbf16>
    %c32 = arith.constant 32 : index
    %c0_55 = arith.constant 0 : index
    %147 = vector.load %arg7[%c32, %c0_55] : memref<36x512xbf16, #tpu.memory_space<vmem>>, vector<4x512xbf16>
    tpu.vector_store %arg7[%c32, %c0_55], %146 {strides = array<i32>} : memref<36x512xbf16, #tpu.memory_space<vmem>>, vector<4x512xbf16>,
    %c0_56 = arith.constant 0 : index
    %c0_57 = arith.constant 0 : index
    %148 = vector.load %arg7[%c0_56, %c0_57] : memref<36x512xbf16, #tpu.memory_space<vmem>>, vector<36x512xbf16>
    %cst_58 = arith.constant dense<0.000000e+00> : vector<4x512xf32>
    %149 = tpu.matmul %105, %148, %cst_58 {dimension_numbers = #tpu.dot_dimension_numbers<[1], [0], [0], [1], [0, 0, 1, 1], [], []>} : vector<4x36xbf16>, vector<36x512xbf16>, vector<4x512xf32> -> vector<4x512xf32>
    %cst_59 = arith.constant dense<0.000000e+00> : vector<4xf32>
    %150 = vector.multi_reduction <add>, %149, %cst_59 [1] : vector<4x512xf32> to vector<4xf32>
    %151 = vector.shape_cast %150 : vector<4xf32> to vector<4x1xf32>
    %cst_60 = arith.constant 0.001953125 : f32
    %152 = vector.broadcast %cst_60 : f32 to vector<4x1xf32>
    %153 = arith.mulf %151, %152 : vector<4x1xf32>
    %154 = vector.broadcast %153 : vector<4x1xf32> to vector<4x512xf32>
    %155 = arith.subf %149, %154 : vector<4x512xf32>
    %156 = arith.mulf %155, %155 : vector<4x512xf32>
    %cst_61 = arith.constant dense<0.000000e+00> : vector<4xf32>
    %157 = vector.multi_reduction <add>, %156, %cst_61 [1] : vector<4x512xf32> to vector<4xf32>
    %158 = vector.shape_cast %157 : vector<4xf32> to vector<4x1xf32>
    %cst_62 = arith.constant 0.001953125 : f32
    %159 = vector.broadcast %cst_62 : f32 to vector<4x1xf32>
    %160 = arith.mulf %158, %159 : vector<4x1xf32>
    %cst_63 = arith.constant 9.99999974E-6 : f32
    %161 = vector.broadcast %cst_63 : f32 to vector<4x1xf32>
    %162 = arith.addf %160, %161 : vector<4x1xf32>
    %163 = math.rsqrt %162 : vector<4x1xf32>
    %164 = arith.mulf %0, %163 : vector<4x1xf32>
    %165 = vector.broadcast %164 : vector<4x1xf32> to vector<4x512xf32>
    %166 = arith.mulf %155, %165 : vector<4x512xf32>
    %167 = vector.broadcast %1 : vector<4x1xf32> to vector<4x512xf32>
    %168 = arith.addf %166, %167 : vector<4x512xf32>
    %169 = vector.extract_strided_slice %168 {offsets = [0, 0], sizes = [2, 512], strides = [1, 1]} : vector<4x512xf32> to vector<2x512xf32>
    %170 = arith.addf %169, %38 : vector<2x512xf32>
    %c0_64 = arith.constant 0 : index
    %c0_65 = arith.constant 0 : index
    %c0_66 = arith.constant 0 : index
    %171 = vector.load %arg6[%c0_64, %c0_65, %c0_66] : memref<1x4x512xf32, #tpu.memory_space<vmem>>, vector<1x2x512xf32>
    %172 = vector.shape_cast %171 : vector<1x2x512xf32> to vector<2x512xf32>
    %173 = vector.shape_cast %170 : vector<2x512xf32> to vector<1x2x512xf32>
    tpu.vector_store %arg6[%c0_64, %c0_65, %c0_66], %173 {strides = array<i32>} : memref<1x4x512xf32, #tpu.memory_space<vmem>>, vector<1x2x512xf32>,
    %174 = vector.extract_strided_slice %168 {offsets = [2, 0], sizes = [2, 512], strides = [1, 1]} : vector<4x512xf32> to vector<2x512xf32>
    %175 = arith.addf %174, %38 : vector<2x512xf32>
    %c0_67 = arith.constant 0 : index
    %c2_68 = arith.constant 2 : index
    %c0_69 = arith.constant 0 : index
    %176 = vector.load %arg6[%c0_67, %c2_68, %c0_69] : memref<1x4x512xf32, #tpu.memory_space<vmem>>, vector<1x2x512xf32>
    %177 = vector.shape_cast %176 : vector<1x2x512xf32> to vector<2x512xf32>
    %178 = vector.shape_cast %175 : vector<2x512xf32> to vector<1x2x512xf32>
    tpu.vector_store %arg6[%c0_67, %c2_68, %c0_69], %178 {strides = array<i32>} : memref<1x4x512xf32, #tpu.memory_space<vmem>>, vector<1x2x512xf32>,
    return
  }
  func.func @transform_0(%arg0: i32) -> (i32, i32, i32) {
    %c0_i32 = arith.constant 0 : i32
    %c0_i32_0 = arith.constant 0 : i32
    %c0_i32_1 = arith.constant 0 : i32
    return %arg0, %c0_i32, %c0_i32_0 : i32, i32, i32
  }
  func.func @transform_1(%arg0: i32) -> (i32, i32) {
    %c0_i32 = arith.constant 0 : i32
    %c0_i32_0 = arith.constant 0 : i32
    %c0_i32_1 = arith.constant 0 : i32
    return %c0_i32, %c0_i32_0 : i32, i32
  }
  func.func @transform_2(%arg0: i32) -> (i32, i32) {
    %c0_i32 = arith.constant 0 : i32
    %c0_i32_0 = arith.constant 0 : i32
    %c0_i32_1 = arith.constant 0 : i32
    return %c0_i32, %c0_i32_0 : i32, i32
  }
  func.func @transform_3(%arg0: i32) -> (i32, i32) {
    %c0_i32 = arith.constant 0 : i32
    %c0_i32_0 = arith.constant 0 : i32
    %c0_i32_1 = arith.constant 0 : i32
    return %c0_i32, %c0_i32_0 : i32, i32
  }
  func.func @transform_4(%arg0: i32) -> (i32, i32) {
    %c0_i32 = arith.constant 0 : i32
    %c0_i32_0 = arith.constant 0 : i32
    %c0_i32_1 = arith.constant 0 : i32
    return %c0_i32, %c0_i32_0 : i32, i32
  }
  func.func @transform_5(%arg0: i32) -> (i32, i32, i32) {
    %c0_i32 = arith.constant 0 : i32
    %c0_i32_0 = arith.constant 0 : i32
    %c0_i32_1 = arith.constant 0 : i32
    return %arg0, %c0_i32, %c0_i32_0 : i32, i32, i32
  }
}

</mosaic_0001>

<bundles_post_ra>
// kernel: tpu_custom_call.1
= control target key start
LH: loop header
LB: loop body
LE: loop exit
PB: predicated region body
PF: predicated region fallthrough
CT: control target
= control target key end

     0   :  { %10 = vsyncpa [#allocation4], 0  ;;  %s2773_s0 = inlined_call_operand.hbm [shape: f32[2,2,512], index: 0, kind: input, shape index: {}]   ;;  %s2774_s1 = inlined_call_operand.vmem [shape: bf16[4,18], index: 1, kind: input, shape index: {}]   ;;  %s2775_s2 = inlined_call_operand.vmem [shape: bf16[4,36], index: 2, kind: input, shape index: {}]   ;;  %s2776_s3 = inlined_call_operand.vmem [shape: f32[4,1], index: 3, kind: input, shape index: {}]   ;;  %s2777_s4 = inlined_call_operand.vmem [shape: f32[4,1], index: 4, kind: input, shape index: {}]   ;;  %s2778_s5 = inlined_call_operand.hbm [shape: f32[2,4,512], index: 5, kind: output, shape index: {}]  }
   0x1   :  { %12 = vsyncpa [#allocation4 + $0x1], 0 }
   0x2   :  { %13 = vsyncpa [#allocation5], 0 }
   0x3   :  { %15 = vsyncpa [#allocation5 + $0x1], 0  ;;  %s1887_s18 = smov 0   ;;  %s1889_s19 = smov 0  }
   0x4   :  { %s1891_s20 = smov 0   ;;  %s1893_s21 = smov 0  }
   0x5 LB: > { %s1908_s22 = sadd.s32 4294967295, %s1842_s21   ;;  %s1506_s23 = sadd.s32 4294967294, %s1842_s21   ;;  %s1842_s21 = sphi %s1893_s21, %s2844_s21   ;;  %s1838_s20 = sphi %s1891_s20, %s2843_s20   ;;  %s1834_s19 = sphi %s1889_s19, %s2842_s19   ;;  %s1830_s18 = sphi %s1887_s18, %s2841_s18  }
   0x6   : > { %s1912_s24 = sadd.s32 1, %s1842_s21   ;;  %s28_s25 = sadd.s32 1, %s1838_s20 }
   0x7   : > { %s25_s26 = ssub.s32 %s1842_s21, %s1912_s24  ;;  %p35_p0 = scmp.ne.s32.totalorder %s1838_s20, %s1834_s19 }
   0x8   : > { %p26_p1 = scmp.eq.s32.totalorder %s25_s26, 0  ;;  %p36_p2 = scmp.eq.s32.totalorder %s1842_s21, 0 }
   0x9   : > { %p41_p3 = scmp.ne.s32.totalorder %s1834_s19, %s1830_s18  ;;  %p42_p4 = scmp.eq.s32.totalorder %s1908_s22, 0 }
   0xa   : > { %s1924_s27 = scalar_select %p26_p1, %s1838_s20, %s28_s25  }
   0xb   : > { %p1926_p5 = por %p36_p2, %p35_p0  ;;  %p1930_p6 = por %p42_p4, %p41_p3 }
   0xc   : > { %p149_p7 = scmp.eq.s32.totalorder %s1908_s22, 1  ;;  %p155_p8 = scmp.eq.s32.totalorder %s1506_s23, 1 }
   0xd   : > { %p1666_p10 = scmp.lt.s32.totalorder %s1842_s21, 2  ;;  %s187_s7 = sand.u32 1, %s1838_s20  }
   0xe   : > { %p1937_p11 = por %p149_p7, %p35_p0  ;;  %p1941_p12 = por %p155_p8, %p41_p3 }
   0xf   : > { %s1616_s8 = sshll.u32 %s1842_s21, 7  ;;  %s1509_s9 = sshll.u32 %s187_s7, 3 }
  0x10   : > { %s2788_s30 = scalar_select %p1937_p11, 1, 0 }
  0x11   : > { %s2789_s6 = scalar_select %p1941_p12, 1, 0 }
  0x12   : > { %s1950_s12 = scalar_lea.hbm %s2773_s0, %s1616_s8  ;;  %s191_s13 = scalar_lea.vmem [#allocation3], %s1509_s9 }
  0x13   : > { %s199_s14 = sshll.u32 %s191_s13, 4  ;;  %p1954_p13 = pnand %p1666_p10, %p1926_p5  ;;  %s1958_s14 = int_to_ptr.vmem [resolvable:$true] %s199_s14 }
  0x14   : > { %s188_s16 = scalar_lea.sflag [#allocation4], %s187_s7  ;;  %s1746_s17 = scalar_lea.hbm %s1950_s12, 128 }
  0x15   : > { %p1747_p2 = scmp.ne.s32.totalorder %s1950_s12, %s1746_s17  ;;  %p1748_p3 = pneg %p1954_p13 }
  0x16   : > { %s1751_s26 = scalar_lea.hbm %s2773_s0, 256  ;;  %p1752_p5 = scmp.lt.u32.totalorder %s1950_s12, %s2773_s0 }
  0x17   : > { %p1749_p4 = pnand %p1748_p3, %p1747_p2  ;;  %p1753_p8 = scmp.lt.u32.totalorder %s1751_s26, %s1746_s17 }
  0x18   : > { %p1755_p9 = scmp.lt.u32.totalorder %s1746_s17, %s1950_s12 }
  0x19   : > { %p1750_p7 = pneg %p1749_p4  ;;  %p1754_p10 = por %p1753_p8, %p1752_p5 }
  0x1b   : > { %p1756_p0 = por %p1755_p9, %p1754_p10 }
  0x1d   : > { %p1757_p1 = pnand %p1756_p0, %p1750_p7 }
  0x1f   : > { %1760 = shalt.err (!%p1757_p1)
}
  0x20   : > { %s1761_s7 = scalar_lea.vmem %s1958_s14, 128  ;;  %s1844_s9 = smov [#allocation3]  }
  0x21   : > { %p1762_p2 = scmp.ne.s32.totalorder %s1958_s14, %s1761_s7  ;;  %s1766_s10 = sshll.u32 %s1844_s9, 4  ;;  %s1767_s10 = int_to_ptr.vmem [resolvable:$false] %s1766_s10 }
  0x22   : > { %s1768_s11 = scalar_lea.vmem %s1767_s10, 256  ;;  %p1769_p11 = scmp.lt.s32.totalorder %s1958_s14, %s1767_s10 }
  0x23   : > { %p1764_p4 = pnand %p1762_p2, %p1748_p3  ;;  %p1770_p5 = scmp.lt.s32.totalorder %s1768_s11, %s1761_s7 }
  0x25   : > { %p1765_p12 = pneg %p1764_p4  ;;  %p1771_p8 = por %p1770_p5, %p1769_p11 }
  0x27   : > { %p1772_p9 = pnand %p1771_p8, %p1765_p12 }
  0x29   : > { %1775 = shalt.err (!%p1772_p9)
}
  0x2a   : > { %1661 = dma.hbm_to_vmem [thread:$0]  (!%p1954_p13), %s1950_s12, 128, %s1958_s14, %s188_s16  }
  0x2b   : > { %p2791_p0 = scmp.lt.s32.totalorder %s1842_s21, 3  ;;  %p2792_p1 = scmp.ge.s32.totalorder %s1842_s21, 1 }
  0x2d   : > { %p205_p3 = pnand %p2792_p1, %p2791_p0 }
  0x2e   : > { %s1992_s13 = sand.u32 (!%p205_p3), 1, %s1834_s19  }
  0x2f   : > { %208 = sbr.rel (%p205_p3) target bundleno = 1814 (0x716), region = 40  ;;  %s1513_s17 = sshll.u32 (!%p205_p3), %s1992_s13, 3 }
  0x30   : > { %s211_s23 = scalar_lea.sflag (!%p205_p3), [#allocation4], %s1992_s13  ;;  %s1996_s25 = scalar_lea.vmem (!%p205_p3), [#allocation3], %s1513_s17 }
  0x36   : > { %1821 = dma.done.wait (%p1930_p6), %s211_s23, 128  }
  0x37   : > { %1823 = vsyncadd (%p1930_p6), %s211_s23, 4294967168  ;;  %v244_v0 = vlaneseq  ;;  %v1845_v1 = vmov 1983009808   ;;  %v357_v6 = vld [vmem:[%s1996_s25] sm:$0xff]  ;;  %s1846_s12 = smov 15   ;;  %s1847_s29 = smov 16  }
  0x38   : > { %v362_v2 = vunpack.c.l.s4 %v1845_v1  ;;  %v360_v8 = vcombine.high %v357_v6, %v357_v6  ;;  %s1848_s14 = smov 1   ;;  %s1849_s15 = smov 127   ;;  %v1854_v14 = vmov 0   ;;  %v1855_v29 = vmov 0.0  }
  0x39   : > { %v365_v3 = vshrl.u32 %v244_v0, 7  ;;  %s1850_s16 = smov 113   ;;  %s1851_s26 = smov 112   ;;  %776 = vmatprep.mubr.bf16.mxu0 %v1854_v14  ;;  %817 = vmatprep.mubr.bf16.mxu1 %v1854_v14  ;;  %v2091_v15 = vand.u32 127, %v244_v0 }
  0x3a   : > { %v363_v4 = vunpack.c.0.s8 %v362_v2  ;;  %s1852_s28 = smov 17   ;;  %s1853_s8 = smov 111   ;;  %1711 = vset.pattern.permute.xlu0 %v1854_v14  ;;  %1712 = vset.pattern.permute.xlu1 %v1854_v14 }
  0x3b   : > { %v246_v16 = vadd.s32 128, %v2091_v15  ;;  %v253_v18 = vshra.s32 %v2091_v15, 4  ;;  %v249_v23 = vand.u32 15, %v2091_v15  ;;  %vm424_vm4 = vcmp.lt.s32.totalorder %v2091_v15, 16  ;;  %p2838_p11 = scmp.ne.s32.totalorder %s2788_s30, 0  ;;  %s1856_s9 = smov [#allocation6]  }
  0x3c   : > { %v2002_v5 = vsub.s32 %v363_v4, %v365_v3  ;;  %vm2785_vm7 = vcmp.lt.s32.totalorder %v2091_v15, 15  ;;  %vm498_vm9 = vcmp.lt.s32.totalorder %v2091_v15, 1  ;;  %vm553_vm11 = vcmp.lt.s32.totalorder %v2091_v15, 127  ;;  %s1780_s10 = sshll.u32 %s1856_s9, 4  ;;  %s1781_s10 = int_to_ptr.vmem [resolvable:$false] %s1780_s10 }
  0x3d   : > { %v254_v17 = vshra.s32 %v246_v16, 4  ;;  %v2097_v22 = vand.u32 15, %v253_v18  ;;  %v250_v24 = vand.u32 15, %v246_v16  ;;  %vm2104_vm2 = vcmp.lt.s32.totalorder %v249_v23, 15  ;;  %s1782_s11 = scalar_lea.vmem %s1781_s10, 512 }
  0x3e   : > { %v2006_v7 = vrot.slane %v357_v6, %v2002_v5  ;;  %v2011_v9 = vrot.slane %v360_v8, %v2002_v5  ;;  %vm2159_vm10 = vcmp.ge.s32.totalorder %v249_v23, 1  ;;  %v2197_v60 = vsel %vm2104_vm2, 1.0, %v1855_v29 }
  0x3f   : > { %v2095_v21 = vand.u32 15, %v254_v17  ;;  %vm261_vm1 = vcmp.ge.s32.totalorder %v2097_v22, 1  ;;  %vm2108_vm3 = vcmp.lt.s32.totalorder %v250_v24, 15  ;;  %vm2150_vm8 = vcmp.ge.s32.totalorder %v250_v24, 1 }
  0x40   : > { %453 = vrot.lane.b32.xlu1 %v2006_v7, %s1846_s12  ;;  %416 = vrot.lane.b32.xlu0 %v2006_v7, %s1847_s29  ;;  %v2017_v10 = vcombine.high %v2006_v7, %v2006_v7  ;;  %v2025_v11 = vcombine.high %v2011_v9, %v2011_v9  ;;  %v2121_v31 = vsel %vm261_vm1, 1.0, %v1855_v29  ;;  %vm297_vm5 = vmand %vm261_vm1, %vm2104_vm2  ;;  %v2174_v50 = vsel %vm2150_vm8, 1.0, %v1855_v29 }
  0x41   : > { %vm262_vm0 = vcmp.ge.s32.totalorder %v2095_v21, 1  ;;  %v2148_v39 = vsel %vm297_vm5, 1.0, %v1855_v29  ;;  %v2182_v52 = vsel %vm2159_vm10, 1.0, %v1855_v29  ;;  %v2202_v61 = vsel %vm2108_vm3, 1.0, %v1855_v29 }
  0x42   : > { %v1625_v12 = vpack.c.bf16 %v2017_v10, %v2006_v7  ;;  %v1626_v13 = vpack.c.bf16 %v2025_v11, %v2011_v9  ;;  %v2116_v30 = vsel %vm262_vm0, 1.0, %v1855_v29  ;;  %vm298_vm6 = vmand %vm262_vm0, %vm2108_vm3  ;;  %vm2782_vm12 = vcmp.lt.s32.totalorder %v2097_v22, 15 }
  0x43   : > { %v2145_v38 = vsel %vm298_vm6, 1.0, %v1855_v29  ;;  %vm2780_vm13 = vcmp.lt.s32.totalorder %v2095_v21, 15  ;;  %vm325_vm14 = vmand %vm2782_vm12, %vm2159_vm10  ;;  %vm2783_vm15 = vcmp.lt.s32.totalorder %v2091_v15, 113  ;;  %v247_v16 = vadd.s32 256, %v2091_v15 }
  0x44   : > { %490 = vrot.lane.b32.xlu0 %v2006_v7, %s1848_s14  ;;  %492 = vrot.lane.b32.xlu1 %v2017_v10, %s1848_s14  ;;  %543 = vst [vmem:[#allocation2 + $0x10] sm:$0x11] %v1625_v12  ;;  %544 = vst [vmem:[#allocation2 + $0x18] sm:$0x11] %v1626_v13  ;;  %v248_v17 = vadd.s32 384, %v2091_v15  ;;  %vm2781_vm6 = vcmp.lt.s32.totalorder %v2091_v15, 112 }
  0x45   : > { %vm326_vm5 = vmand %vm2780_vm13, %vm2150_vm8 }
  0x46   : > { %v2236_v23 = vsel %vm326_vm5, 1.0, %v1855_v29  ;;  %vm389_vm5 = vcmp.lt.s32.totalorder %v2091_v15, 17 }
  0x48   : > { %418 = vrot.lane.b32.xlu0 %v2017_v10, %s1847_s29  ;;  %422 = vrot.lane.b32.xlu1 %v2025_v11, %s1847_s29 }
  0x4c   : > { %455 = vrot.lane.b32.xlu0 %v2017_v10, %s1846_s12  ;;  %459 = vrot.lane.b32.xlu1 %v2025_v11, %s1846_s12 }
  0x50   : > { %496 = vrot.lane.b32.xlu0 %v2025_v11, %s1848_s14  ;;  %545 = vrot.lane.b32.xlu1 %v2006_v7, %s1849_s15 }
  0x54   : > { %547 = vrot.lane.b32.xlu0 %v2017_v10, %s1849_s15  ;;  %549 = vrot.lane.b32.xlu1 %v2011_v9, %s1849_s15 }
  0x58   : > { %582 = vrot.lane.b32.xlu0 %v2006_v7, %s1850_s16  ;;  %584 = vrot.lane.b32.xlu1 %v2017_v10, %s1850_s16 }
  0x5c   : > { %586 = vrot.lane.b32.xlu0 %v2011_v9, %s1850_s16  ;;  %619 = vrot.lane.b32.xlu1 %v2006_v7, %s1851_s26 }
  0x60   : > { %621 = vrot.lane.b32.xlu0 %v2017_v10, %s1851_s26  ;;  %623 = vrot.lane.b32.xlu1 %v2011_v9, %s1851_s26 }
  0x64   : > { %381 = vrot.lane.b32.xlu0 %v2006_v7, %s1852_s28  ;;  %383 = vrot.lane.b32.xlu1 %v2017_v10, %s1852_s28 }
  0x68   : > { %387 = vrot.lane.b32.xlu0 %v2025_v11, %s1852_s28  ;;  %420 = vrot.lane.b32.xlu1 %v2011_v9, %s1847_s29 }
  0x6c   : > { %457 = vrot.lane.b32.xlu0 %v2011_v9, %s1846_s12  ;;  %494 = vrot.lane.b32.xlu1 %v2011_v9, %s1848_s14 }
  0x70   : > { %551 = vrot.lane.b32.xlu0 %v2025_v11, %s1849_s15  ;;  %588 = vrot.lane.b32.xlu1 %v2025_v11, %s1850_s16 }
  0x74   : > { %625 = vrot.lane.b32.xlu0 %v2025_v11, %s1851_s26  ;;  %385 = vrot.lane.b32.xlu1 %v2011_v9, %s1852_s28 }
  0x78   : > { %656 = vrot.lane.b32.xlu0 %v2006_v7, %s1853_s8  ;;  %658 = vrot.lane.b32.xlu1 %v2017_v10, %s1853_s8 }
  0x7c   : > { %660 = vrot.lane.b32.xlu0 %v2011_v9, %s1853_s8  ;;  %662 = vrot.lane.b32.xlu1 %v2025_v11, %s1853_s8 }
  0xb2   : > { %v454_v19 = vpop.permute.xlu1 %453  ;;  %v417_v20 = vpop.permute.xlu0 %416 }
  0xb6   : > { %v491_v25 = vpop.permute.xlu0 %490  ;;  %v2100_v26 = vpop.permute.xlu1 %492 }
  0xb7   : > { %v501_v51 = vsel %vm498_vm9, %v491_v25, %v2100_v26 }
  0xb8   : > { %v504_v57 = vmul.f32 %v2174_v50, %v501_v51 }
  0xba   : > { %v2127_v32 = vpop.permute.xlu0 %418  ;;  %v2129_v33 = vpop.permute.xlu1 %422 }
  0xbb   : > { %v427_v34 = vsel %vm424_vm4, %v417_v20, %v2127_v32  ;;  %v428_v35 = vsel %vm424_vm4, %v2129_v33, %v417_v20 }
  0xbc   : > { %v430_v36 = vmul.f32 %v2116_v30, %v427_v34  ;;  %v429_v37 = vmul.f32 %v2121_v31, %v428_v35  ;;  %v255_v34 = vshra.s32 %v247_v16, 4  ;;  %v256_v35 = vshra.s32 %v248_v17, 4 }
  0xbe   : > { %v1619_v41 = vpack.c.bf16 %v430_v36, %v429_v37  ;;  %v2155_v42 = vpop.permute.xlu0 %455  ;;  %v2157_v43 = vpop.permute.xlu1 %459  ;;  %v2260_v51 = vand.u32 15, %v255_v34 }
  0xbf   : > { %v464_v45 = vsel %vm2785_vm7, %v454_v19, %v2155_v42  ;;  %v465_v46 = vsel %vm2785_vm7, %v2157_v43, %v454_v19  ;;  %v2230_v19 = vsel %vm325_vm14, 1.0, %v1855_v29  ;;  %vm278_vm14 = vmand %vm262_vm0, %vm2150_vm8 }
  0xc0   : > { %v447_v47 = vrot.slane %v1619_v41, 7  ;;  %v467_v48 = vmul.f32 %v2145_v38, %v464_v45  ;;  %v466_v49 = vmul.f32 %v2148_v39, %v465_v46  ;;  %v2251_v45 = vsel %vm2782_vm12, 1.0, %v1855_v29 }
  0xc1   : > { %v2256_v46 = vsel %vm2780_vm13, 1.0, %v1855_v29  ;;  %vm277_vm13 = vmand %vm261_vm1, %vm2159_vm10 }
  0xc2   : > { %451 = vst [vmem:[#allocation2] sm:$0x22] %v447_v47  ;;  %v1621_v53 = vpack.c.bf16 %v467_v48, %v466_v49  ;;  %v2184_v54 = vpop.permute.xlu0 %496  ;;  %v2186_v55 = vpop.permute.xlu1 %545 }
  0xc3   : > { %v502_v56 = vsel %vm498_vm9, %v2184_v54, %v491_v25 }
  0xc4   : > { %v484_v58 = vrot.slane %v1621_v53, 6  ;;  %v503_v59 = vmul.f32 %v2182_v52, %v502_v56  ;;  %v2262_v53 = vand.u32 15, %v256_v35  ;;  %v251_v56 = vand.u32 15, %v247_v16 }
  0xc5   : > { %v2300_v16 = vsel %vm277_vm13, 1.0, %v1855_v29 }
  0xc6   : > { %488 = vst [vmem:[#allocation2] sm:$0x44] %v484_v58  ;;  %v1623_v62 = vpack.c.bf16 %v504_v57, %v503_v59  ;;  %v548_v63 = vpop.permute.xlu0 %547  ;;  %v2204_v0 = vpop.permute.xlu1 %549  ;;  %v252_v59 = vand.u32 15, %v248_v17  ;;  %vm2784_vm12 = vcmp.ge.s32.totalorder %v2262_v53, 1  ;;  %vm2326_vm10 = vcmp.ge.s32.totalorder %v251_v56, 1 }
  0xc7   : > { %v556_v1 = vsel %vm553_vm11, %v2186_v55, %v548_v63  ;;  %v555_v2 = vsel %vm553_vm11, %v548_v63, %v2204_v0 }
  0xc8   : > { %v521_v3 = vrot.slane %v1623_v62, 5  ;;  %v558_v4 = vmul.f32 %v2197_v60, %v556_v1  ;;  %v559_v6 = vmul.f32 %v2202_v61, %v555_v2  ;;  %vm2289_vm0 = vcmp.lt.s32.totalorder %v252_v59, 15 }
  0xc9   : > { %vm300_vm8 = vmand %vm2784_vm12, %vm2289_vm0  ;;  %vm2330_vm13 = vcmp.ge.s32.totalorder %v252_v59, 1 }
  0xca   : > { %525 = vst [vmem:[#allocation2] sm:$0x88] %v521_v3  ;;  %v1627_v8 = vpack.c.bf16 %v559_v6, %v558_v4  ;;  %v2220_v12 = vpop.permute.xlu0 %582  ;;  %v585_v13 = vpop.permute.xlu1 %584 }
  0xcb   : > { %v593_v20 = vsel %vm2783_vm15, %v2220_v12, %v585_v13 }
  0xcc   : > { %v576_v18 = vrot.slane %v1627_v8, 7  ;;  %v595_v37 = vmul.f32 %v2230_v19, %v593_v20 }
  0xce   : > { %580 = vst [vmem:[#allocation2 + $0x10] sm:$0x22] %v576_v18  ;;  %v2238_v24 = vpop.permute.xlu0 %586  ;;  %v2240_v25 = vpop.permute.xlu1 %619  ;;  %v2310_v18 = vsel %vm2784_vm12, 1.0, %v1855_v29  ;;  %vm268_vm12 = vcmp.lt.s32.totalorder %v2262_v53, 15 }
  0xcf   : > { %v592_v36 = vsel %vm2783_vm15, %v585_v13, %v2238_v24  ;;  %vm2285_vm15 = vcmp.lt.s32.totalorder %v251_v56, 15  ;;  %v2294_v13 = vsel %vm278_vm14, 1.0, %v1855_v29  ;;  %vm267_vm14 = vcmp.lt.s32.totalorder %v2260_v51, 15 }
  0xd0   : > { %v596_v41 = vmul.f32 %v2236_v23, %v592_v36 }
  0xd2   : > { %v1629_v47 = vpack.c.bf16 %v596_v41, %v595_v37  ;;  %v622_v48 = vpop.permute.xlu0 %621  ;;  %v2258_v49 = vpop.permute.xlu1 %623 }
  0xd3   : > { %v630_v57 = vsel %vm2781_vm6, %v2240_v25, %v622_v48  ;;  %v629_v58 = vsel %vm2781_vm6, %v622_v48, %v2258_v49  ;;  %vm263_vm6 = vcmp.ge.s32.totalorder %v2260_v51, 1 }
  0xd4   : > { %v613_v62 = vrot.slane %v1629_v47, 6  ;;  %v632_v63 = vmul.f32 %v2251_v45, %v630_v57  ;;  %v633_v1 = vmul.f32 %v2256_v46, %v629_v58  ;;  %v2305_v17 = vsel %vm263_vm6, 1.0, %v1855_v29  ;;  %vm2316_vm1 = vmand %vm263_vm6, %vm2285_vm15 }
  0xd6   : > { %617 = vst [vmem:[#allocation2 + $0x10] sm:$0x44] %v613_v62  ;;  %v1631_v2 = vpack.c.bf16 %v633_v1, %v632_v63  ;;  %v382_v3 = vpop.permute.xlu0 %381  ;;  %v2277_v4 = vpop.permute.xlu1 %383  ;;  %v2352_v62 = vsel %vm2316_vm1, 1.0, %v1855_v29  ;;  %vm2371_vm1 = vmand %vm267_vm14, %vm2326_vm10 }
  0xd7   : > { %v392_v44 = vsel %vm389_vm5, %v382_v3, %v2277_v4 }
  0xd8   : > { %v650_v8 = vrot.slane %v1631_v2, 5  ;;  %v395_v56 = vmul.f32 %v2294_v13, %v392_v44 }
  0xda   : > { %654 = vst [vmem:[#allocation2 + $0x10] sm:$0x88] %v650_v8  ;;  %v2320_v34 = vpop.permute.xlu0 %387  ;;  %v421_v35 = vpop.permute.xlu1 %420 }
  0xdb   : > { %v393_v41 = vsel %vm389_vm5, %v2320_v34, %v382_v3  ;;  %v425_v47 = vsel %vm424_vm4, %v421_v35, %v2129_v33  ;;  %v426_v48 = vsel %vm424_vm4, %v2127_v32, %v421_v35  ;;  %v2355_v33 = vsel %vm300_vm8, 1.0, %v1855_v29  ;;  %vm328_vm8 = vmand %vm268_vm12, %vm2330_vm13 }
  0xdc   : > { %v394_v57 = vmul.f32 %v2300_v16, %v393_v41  ;;  %v431_v58 = vmul.f32 %v2305_v17, %v426_v48  ;;  %v432_v59 = vmul.f32 %v2310_v18, %v425_v47  ;;  %v2360_v32 = vsel %vm2326_vm10, 1.0, %v1855_v29 }
  0xdd   : > { %v2365_v3 = vsel %vm2330_vm13, 1.0, %v1855_v29 }
  0xde   : > { %v1617_v63 = vpack.c.bf16 %v395_v56, %v394_v57  ;;  %v1620_v1 = vpack.c.bf16 %v432_v59, %v431_v58  ;;  %v458_v2 = vpop.permute.xlu0 %457  ;;  %v495_v8 = vpop.permute.xlu1 %494 }
  0xdf   : > { %v462_v20 = vsel %vm2785_vm7, %v458_v2, %v2157_v43  ;;  %v463_v35 = vsel %vm2785_vm7, %v2155_v42, %v458_v2  ;;  %v499_v41 = vsel %vm498_vm9, %v495_v8, %v2184_v54  ;;  %v500_v47 = vsel %vm498_vm9, %v2100_v26, %v495_v8  ;;  %vm2422_vm7 = vmand %vm263_vm6, %vm2326_vm10 }
  0xe0   : > { %414 = vst [vmem:[#allocation2] sm:$0x11] %v1617_v63  ;;  %v448_v48 = vrot.slane %v1620_v1, 7  ;;  %v468_v43 = vmul.f32 %v2352_v62, %v463_v35  ;;  %v469_v56 = vmul.f32 %v2355_v33, %v462_v20  ;;  %v505_v42 = vmul.f32 %v2360_v32, %v500_v47 }
  0xe1   : > { %v506_v57 = vmul.f32 %v2365_v3, %v499_v41  ;;  %v2398_v54 = vsel %vm2285_vm15, 1.0, %v1855_v29  ;;  %v2403_v26 = vsel %vm2289_vm0, 1.0, %v1855_v29  ;;  %v2408_v63 = vsel %vm2371_vm1, 1.0, %v1855_v29 }
  0xe2   : > { %452 = vst [vmem:[#allocation2 + $0x8] sm:$0x22] %v448_v48  ;;  %v1622_v58 = vpack.c.bf16 %v469_v56, %v468_v43  ;;  %v552_v59 = vpop.permute.xlu0 %551  ;;  %v2411_v1 = vsel %vm328_vm8, 1.0, %v1855_v29  ;;  %v589_v2 = vpop.permute.xlu1 %588  ;;  %v2416_v8 = vsel %vm267_vm14, 1.0, %v1855_v29  ;;  %vm2815_vm1 = vcmp.lt.s32.totalorder %v2091_v15, 113 }
  0xe3   : > { %v1624_v44 = vpack.c.bf16 %v506_v57, %v505_v42  ;;  %v554_v35 = vsel %vm553_vm11, %v2204_v0, %v552_v59  ;;  %v557_v41 = vsel %vm553_vm11, %v552_v59, %v2186_v55  ;;  %v591_v47 = vsel %vm2815_vm1, %v2238_v24, %v589_v2  ;;  %vm2817_vm8 = vmmov %vm2815_vm1 }
  0xe4   : > { %vm2816_vm6 = vcmp.ge.s32.totalorder %v2262_v53, 1  ;;  %v485_v36 = vrot.slane %v1622_v58, 6  ;;  %v560_v48 = vmul.f32 %v2398_v54, %v554_v35  ;;  %v561_v43 = vmul.f32 %v2403_v26, %v557_v41 }
  0xe5   : > { %vm280_vm10 = vmand %vm2816_vm6, %vm2330_vm13  ;;  %v594_v0 = vsel %vm2817_vm8, %v589_v2, %v2220_v12  ;;  %v522_v56 = vrot.slane %v1624_v44, 5  ;;  %v597_v55 = vmul.f32 %v2408_v63, %v591_v47  ;;  %v2449_v24 = vsel %vm268_vm12, 1.0, %v1855_v29 }
  0xe6   : > { %v598_v42 = vmul.f32 %v2411_v1, %v594_v0  ;;  %489 = vst [vmem:[#allocation2 + $0x8] sm:$0x44] %v485_v36  ;;  %v1628_v37 = vpack.c.bf16 %v561_v43, %v560_v48  ;;  %v626_v57 = vpop.permute.xlu0 %625  ;;  %v2454_v58 = vsel %vm2422_vm7, 1.0, %v1855_v29  ;;  %v2457_v12 = vsel %vm280_vm10, 1.0, %v1855_v29  ;;  %v386_v59 = vpop.permute.xlu1 %385  ;;  %vm347_vm8 = vmand %vm267_vm14, %vm2285_vm15 }
  0xe7   : > { %vm2818_vm13 = vcmp.lt.s32.totalorder %v2097_v22, 15  ;;  %526 = vst [vmem:[#allocation2 + $0x8] sm:$0x88] %v522_v56  ;;  %vm2821_vm6 = vcmp.lt.s32.totalorder %v2091_v15, 112  ;;  %v390_v27 = vsel %vm389_vm5, %v386_v59, %v2320_v34  ;;  %v1714_v41 = vld [vmem:[#allocation2 + $0x4] ss:$16 sps:$4 sm:$0xff]   ;;  %v391_v43 = vsel %vm389_vm5, %v2277_v4, %v386_v59 }
  0xe8   : > { %vm2463_vm1 = vmand %vm2818_vm13, %vm2104_vm2  ;;  %v1630_v44 = vpack.c.bf16 %v598_v42, %v597_v55  ;;  %v628_v20 = vsel %vm2821_vm6, %v2258_v49, %v626_v57  ;;  %v1716_v22 = vld [vmem:[#allocation2] ss:$16 sps:$4 sm:$0xff]   ;;  %v577_v47 = vrot.slane %v1628_v37, 7  ;;  %vm2823_vm2 = vcmp.lt.s32.totalorder %v2095_v21, 15  ;;  %744 = vmatprep.subr.bf16.mxu0 %v1714_v41 }
  0xe9   : > { %vm2822_vm7 = vmmov %vm2821_vm6  ;;  %v634_v36 = vmul.f32 %v2416_v8, %v628_v20  ;;  %v396_v34 = vmul.f32 %v2454_v58, %v391_v43  ;;  %v397_v0 = vmul.f32 %v2457_v12, %v390_v27  ;;  %vm664_vm13 = vcmp.lt.s32.totalorder %v2091_v15, 111  ;;  %745 = vmatpush1.bf16.msra.mxu0 %v1716_v22 }
  0xea   : > { %v631_v35 = vsel %vm2822_vm7, %v626_v57, %v2240_v25  ;;  %vm2485_vm10 = vmand %vm2823_vm2, %vm2108_vm3  ;;  %v614_v49 = vrot.slane %v1630_v44, 6  ;;  %581 = vst [vmem:[#allocation2 + $0x18] sm:$0x22] %v577_v47  ;;  %v657_v28 = vpop.permute.xlu0 %656  ;;  %v659_v21 = vpop.permute.xlu1 %658  ;;  %v2503_v51 = vsel %vm2463_vm1, 1.0, %v1855_v29  ;;  %v2513_v53 = vsel %vm347_vm8, 1.0, %v1855_v29 }
  0xeb   : > { %v635_v48 = vmul.f32 %v2449_v24, %v631_v35  ;;  %vm348_vm3 = vmand %vm268_vm12, %vm2289_vm0  ;;  %v1618_v56 = vpack.c.bf16 %v397_v0, %v396_v34  ;;  %v667_v40 = vsel %vm664_vm13, %v657_v28, %v659_v21  ;;  %v2510_v42 = vsel %vm2485_vm10, 1.0, %v1855_v29 }
  0xec   : > { %618 = vst [vmem:[#allocation2 + $0x18] sm:$0x44] %v614_v49  ;;  %v2516_v6 = vsel %vm348_vm3, 1.0, %v1855_v29  ;;  %v669_v20 = vmul.f32 %v2503_v51, %v667_v40  ;;  %vm731_vm12 = vcmask 1040384   ;;  %vm727_vm15 = vcmask 146432  }
  0xed   : > { %v1632_v4 = vpack.c.bf16 %v635_v48, %v634_v36  ;;  %415 = vst [vmem:[#allocation2 + $0x8] sm:$0x11] %v1618_v56  ;;  %vm826_vm0 = vcmask 1043456   ;;  %vm2834_vm10 = vcmp.lt.s32.totalorder %v2091_v15, 113 }
  0xee   : > { %v661_v37 = vpop.permute.xlu0 %660  ;;  %v663_v57 = vpop.permute.xlu1 %662  ;;  %vm2835_vm8 = vmmov %vm2834_vm10 }
  0xef   : > { %v651_v55 = vrot.slane %v1632_v4, 5  ;;  %v666_v59 = vsel %vm664_vm13, %v659_v21, %v661_v37  ;;  %v665_v2 = vsel %vm664_vm13, %v661_v37, %v663_v57  ;;  %v668_v44 = vsel %vm664_vm13, %v663_v57, %v657_v28  ;;  %v358_v21 = vld [vmem:[%s2774_s1] sm:$0x3]  ;;  %vm2836_vm3 = vmmov %vm2835_vm8 }
  0xf0   : > { %v670_v35 = vmul.f32 %v2510_v42, %v666_v59  ;;  %v671_v27 = vmul.f32 %v2513_v53, %v665_v2  ;;  %v672_v29 = vmul.f32 %v2516_v6, %v668_v44 }
  0xf1   : > { %655 = vst [vmem:[#allocation2 + $0x18] sm:$0x88] %v651_v55 }
  0xf2   : > { %v1633_v41 = vpack.c.bf16 %v670_v35, %v669_v20  ;;  %v1634_v22 = vpack.c.bf16 %v672_v29, %v671_v27 }
  0xf4   : > { %689 = vst [vmem:[#allocation2 + $0x20] sm:$0x11] %v1633_v41  ;;  %690 = vst [vmem:[#allocation2 + $0x28] sm:$0x11] %v1634_v22 }
  0xf8   : > { %v1717_v47 = vld [vmem:[#allocation2 + $0xc] ss:$16 sps:$4 sm:$0xff]   ;;  %v1719_v36 = vld [vmem:[#allocation2 + $0x8] ss:$16 sps:$4 sm:$0xff]  }
  0xf9   : > { %785 = vmatprep.subr.bf16.mxu1 %v1717_v47 }
  0xfa   : > { %786 = vmatpush1.bf16.msra.mxu1 %v1719_v36 }
  0xfb   : > { %v695_v48 = vld [vmem:[#allocation2 + $0x20] sm:$0x11]  ;;  %v696_v43 = vld [vmem:[#allocation2 + $0x28] sm:$0x11] }
  0xfc   : > { %v1570_v25 = vcombine.high %v695_v48, %v695_v48  ;;  %v1572_v49 = vcombine.high %v696_v43, %v696_v43  ;;  %v1569_v34 = vcombine.low %v695_v48, %v695_v48  ;;  %v1571_v0 = vcombine.low %v696_v43, %v696_v43 }
  0xfe   : > { %1573 = vmatprep.subr.msk.bf16.mxu0 %vm731_vm12, %v1570_v25  ;;  %1575 = vmatprep.subr.msk.bf16.mxu1 %vm731_vm12, %v1572_v49  ;;  %v733_v4 = vsel %vm731_vm12, %v1569_v34, 0  ;;  %v739_v28 = vsel %vm731_vm12, %v1571_v0, 0  ;;  %vm2837_vm12 = vmmov %vm2836_vm3 }
  0xff   : > { %747 = vmatpush1.bf16.msra.mxu0 %v733_v4  ;;  %788 = vmatpush1.bf16.msra.mxu1 %v739_v28 }
 0x102   : > { %1574 = vmatmul.mubr.msk.bf16.vlgmr.msra.gmra.mrb[0].mxu0 %vm727_vm15, %v358_v21  ;;  %1576 = vmatmul.mubr.msk.bf16.vlgmr.msra.gmra.mrb[0].mxu1 %vm727_vm15, %v358_v21 }
 0x103   : > { %1288 = vmatprep.mubr.bf16.mxu0 %v1854_v14  ;;  %1329 = vmatprep.mubr.bf16.mxu1 %v1854_v14 }
 0x1d5   : > { %v778_v56 = vpop.f32.mrb[0].mxu0  ;;  %v819_v55 = vpop.f32.mrb[0].mxu1 }
 0x1d6   : > { %v827_v40 = vsel %vm826_vm0, %v778_v56, 0.0  ;;  %v780_v37 = vpop.f32.mrb[1].mxu0  ;;  %v821_v57 = vpop.f32.mrb[1].mxu1  ;;  %v830_v59 = vsel %vm826_vm0, %v819_v55, 0.0 }
 0x1d7   : > { %v828_v2 = vsel %vm826_vm0, %v780_v37, 0.0  ;;  %v782_v44 = vpop.f32.mrb[2].mxu0  ;;  %v823_v20 = vpop.f32.mrb[2].mxu1  ;;  %v832_v22 = vsel %vm826_vm0, %v821_v57, 0.0 }
 0x1d8   : > { %v829_v35 = vadd.f32 %v828_v2, %v827_v40  ;;  %v783_v27 = vpop.f32.mrb[3].mxu0  ;;  %v824_v29 = vpop.f32.mrb[3].mxu1 }
 0x1d9   : > { %v2547_v27 = vld [vmem:[%s2776_s3] sm:$0xf] }
 0x1da   : > { %v831_v41 = vadd.f32 %v830_v59, %v829_v35 }
 0x1dc   : > { %v833_v14 = vadd.f32 %v832_v22, %v831_v41 }
 0x1de   : > { %834 = vadd.xlane.f32.xlu0 %v833_v14 }
 0x26b   : > { %v835_v47 = vpop.xlane.xlu0 %834 }
 0x26c   : > { %v836_v36 = vmul.f32 0.001953125, %v835_v47 }
 0x26e   : > { %v837_v48 = vsub.f32 %v778_v56, %v836_v36  ;;  %v838_v43 = vsub.f32 %v780_v37, %v836_v36  ;;  %v839_v25 = vsub.f32 %v819_v55, %v836_v36  ;;  %v840_v49 = vsub.f32 %v821_v57, %v836_v36  ;;  %v243_v56 = vld [vmem:[%s2777_s4] sm:$0xf] }
 0x270   : > { %v841_v34 = vmul.f32 %v837_v48, %v837_v48  ;;  %v842_v0 = vmul.f32 %v838_v43, %v838_v43  ;;  %v843_v4 = vmul.f32 %v839_v25, %v839_v25  ;;  %v844_v28 = vmul.f32 %v840_v49, %v840_v49 }
 0x272   : > { %v845_v21 = vsel %vm826_vm0, %v841_v34, 0.0  ;;  %v846_v40 = vsel %vm826_vm0, %v842_v0, 0.0  ;;  %v848_v59 = vsel %vm826_vm0, %v843_v4, 0.0  ;;  %v850_v20 = vsel %vm826_vm0, %v844_v28, 0.0 }
 0x273   : > { %v847_v2 = vadd.f32 %v846_v40, %v845_v21 }
 0x275   : > { %v849_v44 = vadd.f32 %v848_v59, %v847_v2 }
 0x277   : > { %v851_v35 = vadd.f32 %v850_v20, %v849_v44 }
 0x279   : > { %852 = vadd.xlane.f32.xlu1 %v851_v35 }
 0x28a   : > { %869 = vperm.xlu1 %1712, %v243_v56  }
 0x306   : > { %v853_v55 = vpop.xlane.xlu1 %852 }
 0x307   : > { %v854_v37 = vmul.f32 0.001953125, %v853_v55 }
 0x309   : > { %v855_v57 = vadd.f32 1e-05, %v854_v37 }
 0x30a   : > { %v2550_v14 = vpop.permute.xlu1 %869 }
 0x30b   : > { %1741 = vrsqrt.f32 %v855_v57 }
 0x315   : > { %v1742_v29 = vpop.eup %1741 }
 0x316   : > { %v857_v41 = vmul.f32 %v1742_v29, %v2547_v27 }
 0x318   : > { %860 = vperm.xlu0 %1711, %v857_v41  }
 0x397   : > { %v861_v22 = vpop.permute.xlu0 %860 }
 0x398   : > { %v863_v47 = vmul.f32 %v861_v22, %v837_v48  ;;  %v864_v36 = vmul.f32 %v861_v22, %v838_v43  ;;  %v865_v34 = vmul.f32 %v861_v22, %v839_v25  ;;  %v866_v0 = vmul.f32 %v861_v22, %v840_v49 }
 0x39a   : > { %v872_v4 = vadd.f32 %v2550_v14, %v863_v47  ;;  %v873_v28 = vadd.f32 %v2550_v14, %v864_v36  ;;  %v874_v21 = vadd.f32 %v2550_v14, %v865_v34  ;;  %v875_v40 = vadd.f32 %v2550_v14, %v866_v0 }
 0x39c   : > { %v876_v2 = vmax.f32 %v872_v4, 0.0  ;;  %v877_v59 = vmax.f32 %v873_v28, 0.0  ;;  %v878_v44 = vmax.f32 %v874_v21, 0.0  ;;  %v879_v20 = vmax.f32 %v875_v40, 0.0 }
 0x39e   : > { %881 = vrot.lane.b32.xlu0 %v876_v2, %s1852_s28  ;;  %915 = vrot.lane.b32.xlu1 %v876_v2, %s1847_s29  ;;  %v1643_v48 = vpack.c.bf16 %v877_v59, %v876_v2  ;;  %v1644_v43 = vpack.c.bf16 %v879_v20, %v878_v44 }
 0x3a0   : > { %1037 = vst [vmem:[#allocation2 + $0x20] sm:$0x33] %v1643_v48  ;;  %1038 = vst [vmem:[#allocation2 + $0x28] sm:$0x33] %v1644_v43 }
 0x3a2   : > { %887 = vrot.lane.b32.xlu0 %v879_v20, %s1852_s28  ;;  %917 = vrot.lane.b32.xlu1 %v877_v59, %s1847_s29 }
 0x3a6   : > { %953 = vrot.lane.b32.xlu0 %v877_v59, %s1846_s12  ;;  %921 = vrot.lane.b32.xlu1 %v879_v20, %s1847_s29 }
 0x3aa   : > { %919 = vrot.lane.b32.xlu0 %v878_v44, %s1847_s29  ;;  %985 = vrot.lane.b32.xlu1 %v876_v2, %s1848_s14 }
 0x3ae   : > { %1039 = vrot.lane.b32.xlu0 %v876_v2, %s1849_s15  ;;  %987 = vrot.lane.b32.xlu1 %v877_v59, %s1848_s14 }
 0x3b2   : > { %1043 = vrot.lane.b32.xlu0 %v878_v44, %s1849_s15  ;;  %991 = vrot.lane.b32.xlu1 %v879_v20, %s1848_s14 }
 0x3b6   : > { %1111 = vrot.lane.b32.xlu0 %v877_v59, %s1851_s26  ;;  %883 = vrot.lane.b32.xlu1 %v877_v59, %s1852_s28 }
 0x3ba   : > { %885 = vrot.lane.b32.xlu0 %v878_v44, %s1852_s28  ;;  %951 = vrot.lane.b32.xlu1 %v876_v2, %s1846_s12 }
 0x3be   : > { %1075 = vrot.lane.b32.xlu0 %v876_v2, %s1850_s16  ;;  %957 = vrot.lane.b32.xlu1 %v879_v20, %s1846_s12 }
 0x3c2   : > { %1079 = vrot.lane.b32.xlu0 %v878_v44, %s1850_s16  ;;  %989 = vrot.lane.b32.xlu1 %v878_v44, %s1848_s14  ;;  %s1514_s14 = sshll.u32 %s1992_s13, 4 }
 0x3c6   : > { %1115 = vrot.lane.b32.xlu0 %v879_v20, %s1851_s26  ;;  %1041 = vrot.lane.b32.xlu1 %v877_v59, %s1849_s15 }
 0x3ca   : > { %1145 = vrot.lane.b32.xlu0 %v876_v2, %s1853_s8  ;;  %1109 = vrot.lane.b32.xlu1 %v876_v2, %s1851_s26 }
 0x3ce   : > { %1149 = vrot.lane.b32.xlu0 %v878_v44, %s1853_s8  ;;  %1113 = vrot.lane.b32.xlu1 %v878_v44, %s1851_s26 }
 0x3d2   : > { %955 = vrot.lane.b32.xlu1 %v878_v44, %s1846_s12 }
 0x3d6   : > { %1077 = vrot.lane.b32.xlu1 %v877_v59, %s1850_s16 }
 0x3da   : > { %1045 = vrot.lane.b32.xlu1 %v879_v20, %s1849_s15  ;;  %s240_s15 = scalar_lea.vmem [#allocation6], %s1514_s14 }
 0x3de   : > { %1081 = vrot.lane.b32.xlu1 %v879_v20, %s1850_s16  ;;  %s1436_s16 = sshll.u32 %s240_s15, 4  ;;  %s2731_s16 = int_to_ptr.vmem [resolvable:$true] %s1436_s16 }
 0x3df   : > { %s1776_s7 = scalar_lea.vmem %s2731_s16, 256  ;;  %p1783_p7 = scmp.lt.s32.totalorder %s2731_s16, %s1781_s10 }
 0x3e0   : > { %p1777_p6 = scmp.ne.s32.totalorder %s2731_s16, %s1776_s7  ;;  %p1784_p10 = scmp.lt.s32.totalorder %s1782_s11, %s1776_s7 }
 0x3e2   : > { %1147 = vrot.lane.b32.xlu1 %v877_v59, %s1853_s8  ;;  %p1778_p12 = pnand %p1777_p6, %p2838_p11  ;;  %p1785_p2 = por %p1784_p10, %p1783_p7 }
 0x3e4   : > { %p1779_p13 = pneg %p1778_p12 }
 0x3e6   : > { %1151 = vrot.lane.b32.xlu1 %v879_v20, %s1853_s8  ;;  %p1786_p4 = pnand %p1785_p2, %p1779_p13 }
 0x410   : > { %v882_v25 = vpop.permute.xlu0 %881  ;;  %v916_v49 = vpop.permute.xlu1 %915 }
 0x414   : > { %v888_v35 = vpop.permute.xlu0 %887  ;;  %v918_v56 = vpop.permute.xlu1 %917 }
 0x415   : > { %v925_v55 = vsel %vm424_vm4, %v916_v49, %v918_v56 }
 0x416   : > { %v928_v41 = vmul.f32 %v2116_v30, %v925_v55 }
 0x418   : > { %v2590_v37 = vpop.permute.xlu0 %953  ;;  %v922_v57 = vpop.permute.xlu1 %921 }
 0x419   : > { %v926_v29 = vsel %vm424_vm4, %v922_v57, %v916_v49  ;;  %v892_v49 = vsel %vm389_vm5, %v888_v35, %v882_v25 }
 0x41a   : > { %v927_v22 = vmul.f32 %v2121_v31, %v926_v29 }
 0x41c   : > { %v1637_v47 = vpack.c.bf16 %v928_v41, %v927_v22  ;;  %v920_v36 = vpop.permute.xlu0 %919  ;;  %v986_v34 = vpop.permute.xlu1 %985  ;;  %v893_v41 = vmul.f32 %v2300_v16, %v892_v49 }
 0x41d   : > { %v923_v0 = vsel %vm424_vm4, %v920_v36, %v922_v57  ;;  %v924_v4 = vsel %vm424_vm4, %v918_v56, %v920_v36  ;;  %vm2826_vm4 = vcmp.lt.s32.totalorder %v2091_v15, 15  ;;  %v880_v15 = vld [vmem:[%s2775_s2] sm:$0x3] }
 0x41e   : > { %v945_v28 = vrot.slane %v1637_v47, 6  ;;  %v929_v21 = vmul.f32 %v2305_v17, %v924_v4  ;;  %v930_v40 = vmul.f32 %v2310_v18, %v923_v0  ;;  %vm2827_vm14 = vmmov %vm2826_vm4 }
 0x41f   : > { %vm2832_vm7 = vmmov %vm2826_vm4 }
 0x420   : > { %949 = vst [vmem:[#allocation2] sm:$0xcc] %v945_v28  ;;  %v1638_v2 = vpack.c.bf16 %v930_v40, %v929_v21  ;;  %v2602_v59 = vpop.permute.xlu0 %1039  ;;  %v988_v30 = vpop.permute.xlu1 %987  ;;  %vm2833_vm2 = vmmov %vm2826_vm4 }
 0x421   : > { %v995_v44 = vsel %vm498_vm9, %v986_v34, %v988_v30 }
 0x422   : > { %v946_v31 = vrot.slane %v1638_v2, 6  ;;  %v998_v17 = vmul.f32 %v2174_v50, %v995_v44 }
 0x424   : > { %950 = vst [vmem:[#allocation2 + $0x8] sm:$0xcc] %v946_v31  ;;  %v2606_v20 = vpop.permute.xlu0 %1043  ;;  %v992_v48 = vpop.permute.xlu1 %991 }
 0x425   : > { %v996_v43 = vsel %vm498_vm9, %v992_v48, %v986_v34 }
 0x426   : > { %v997_v18 = vmul.f32 %v2182_v52, %v996_v43 }
 0x428   : > { %v1641_v56 = vpack.c.bf16 %v998_v17, %v997_v18  ;;  %v1112_v55 = vpop.permute.xlu0 %1111  ;;  %v884_v57 = vpop.permute.xlu1 %883 }
 0x429   : > { %v891_v29 = vsel %vm389_vm5, %v882_v25, %v884_v57 }
 0x42a   : > { %v1015_v22 = vrot.slane %v1641_v56, 6  ;;  %v894_v47 = vmul.f32 %v2294_v13, %v891_v29 }
 0x42c   : > { %1019 = vst [vmem:[#allocation2 + $0x10] sm:$0xcc] %v1015_v22  ;;  %v1635_v36 = vpack.c.bf16 %v894_v47, %v893_v41  ;;  %v886_v34 = vpop.permute.xlu0 %885  ;;  %v952_v50 = vpop.permute.xlu1 %951 }
 0x42d   : > { %v889_v52 = vsel %vm389_vm5, %v886_v34, %v888_v35  ;;  %v890_v0 = vsel %vm389_vm5, %v884_v57, %v886_v34  ;;  %v961_v16 = vsel %vm2826_vm4, %v952_v50, %v2590_v37  ;;  %vm2829_vm5 = vmmov %vm2821_vm6 }
 0x42e   : > { %913 = vst [vmem:[#allocation2] sm:$0x33] %v1635_v36  ;;  %v895_v4 = vmul.f32 %v2454_v58, %v890_v0  ;;  %v896_v25 = vmul.f32 %v2457_v12, %v889_v52  ;;  %v964_v35 = vmul.f32 %v2145_v38, %v961_v16  ;;  %vm2830_vm1 = vmmov %vm2829_vm5 }
 0x430   : > { %v1636_v13 = vpack.c.bf16 %v896_v25, %v895_v4  ;;  %v958_v28 = vpop.permute.xlu1 %957  ;;  %v2630_v40 = vpop.permute.xlu0 %1075 }
 0x431   : > { %v962_v21 = vsel %vm2827_vm14, %v958_v28, %v952_v50 }
 0x432   : > { %914 = vst [vmem:[#allocation2 + $0x8] sm:$0x33] %v1636_v13  ;;  %v963_v2 = vmul.f32 %v2148_v39, %v962_v21 }
 0x434   : > { %v1639_v31 = vpack.c.bf16 %v964_v35, %v963_v2  ;;  %v990_v58 = vpop.permute.xlu1 %989  ;;  %v1080_v18 = vpop.permute.xlu0 %1079 }
 0x435   : > { %v993_v12 = vsel %vm498_vm9, %v990_v58, %v992_v48  ;;  %v994_v44 = vsel %vm498_vm9, %v988_v30, %v990_v58  ;;  %vm2828_vm9 = vmmov %vm2821_vm6 }
 0x436   : > { %983 = vst [vmem:[#allocation2 + $0x10] sm:$0x33] %v1639_v31  ;;  %v999_v43 = vmul.f32 %v2360_v32, %v994_v44  ;;  %v1000_v17 = vmul.f32 %v2365_v3, %v993_v12  ;;  %vm2831_vm6 = vmmov %vm2830_vm1 }
 0x438   : > { %v1642_v49 = vpack.c.bf16 %v1000_v17, %v999_v43  ;;  %v1042_v38 = vpop.permute.xlu1 %1041  ;;  %v1116_v22 = vpop.permute.xlu0 %1115 }
 0x439   : > { %v1048_v39 = vsel %vm553_vm11, %v1042_v38, %v2606_v20  ;;  %v1049_v56 = vsel %vm553_vm11, %v2602_v59, %v1042_v38 }
 0x43a   : > { %v1016_v48 = vrot.slane %v1642_v49, 6  ;;  %v1051_v57 = vmul.f32 %v2197_v60, %v1049_v56  ;;  %v1052_v30 = vmul.f32 %v2202_v61, %v1048_v39 }
 0x43c   : > { %1020 = vst [vmem:[#allocation2 + $0x18] sm:$0xcc] %v1016_v48  ;;  %v1645_v32 = vpack.c.bf16 %v1052_v30, %v1051_v57  ;;  %v1110_v29 = vpop.permute.xlu1 %1109  ;;  %v1146_v17 = vpop.permute.xlu0 %1145 }
 0x43d   : > { %v1724_v3 = vld [vmem:[#allocation2] ss:$16 sps:$4 sm:$0xff]   ;;  %v1726_v41 = vld [vmem:[#allocation2 + $0x4] ss:$16 sps:$4 sm:$0xff]   ;;  %v1119_v36 = vsel %vm2828_vm9, %v1110_v29, %v1112_v55  ;;  %v1120_v34 = vsel %vm2829_vm5, %v1116_v22, %v1110_v29 }
 0x43e   : > { %v1069_v47 = vrot.slane %v1645_v32, 6  ;;  %1256 = vmatprep.subr.bf16.mxu0 %v1726_v41  ;;  %v1121_v52 = vmul.f32 %v2251_v45, %v1119_v36  ;;  %v1124_v0 = vmul.f32 %v2449_v24, %v1120_v34 }
 0x43f   : > { %1257 = vmatpush1.bf16.msra.mxu0 %v1724_v3 }
 0x440   : > { %1073 = vst [vmem:[#allocation2 + $0x20] sm:$0xcc] %v1069_v47  ;;  %v1114_v50 = vpop.permute.xlu1 %1113 }
 0x441   : > { %v1117_v60 = vsel %vm2830_vm1, %v1114_v50, %v1116_v22  ;;  %v1118_v61 = vsel %vm2831_vm6, %v1112_v55, %v1114_v50 }
 0x442   : > { %v1122_v4 = vmul.f32 %v2256_v46, %v1118_v61  ;;  %v1123_v25 = vmul.f32 %v2416_v8, %v1117_v60 }
 0x444   : > { %v1649_v16 = vpack.c.bf16 %v1122_v4, %v1121_v52  ;;  %v1650_v13 = vpack.c.bf16 %v1124_v0, %v1123_v25  ;;  %v956_v21 = vpop.permute.xlu1 %955 }
 0x445   : > { %v959_v35 = vsel %vm2832_vm7, %v956_v21, %v958_v28  ;;  %v960_v2 = vsel %vm2833_vm2, %v2590_v37, %v956_v21 }
 0x446   : > { %v1139_v31 = vrot.slane %v1649_v16, 6  ;;  %v1140_v55 = vrot.slane %v1650_v13, 6  ;;  %v965_v45 = vmul.f32 %v2352_v62, %v960_v2  ;;  %v966_v24 = vmul.f32 %v2355_v33, %v959_v35 }
 0x448   : > { %1143 = vst [vmem:[#allocation2 + $0x30] sm:$0xcc] %v1139_v31  ;;  %1144 = vst [vmem:[#allocation2 + $0x38] sm:$0xcc] %v1140_v55  ;;  %v1640_v46 = vpack.c.bf16 %v966_v24, %v965_v45  ;;  %v1078_v8 = vpop.permute.xlu1 %1077 }
 0x449   : > { %v1084_v58 = vsel %vm2834_vm10, %v1078_v8, %v1080_v18  ;;  %v1085_v28 = vsel %vm2835_vm8, %v2630_v40, %v1078_v8 }
 0x44a   : > { %984 = vst [vmem:[#allocation2 + $0x18] sm:$0x33] %v1640_v46  ;;  %v1087_v37 = vmul.f32 %v2230_v19, %v1085_v28  ;;  %v1088_v12 = vmul.f32 %v2236_v23, %v1084_v58 }
 0x44c   : > { %v1647_v44 = vpack.c.bf16 %v1088_v12, %v1087_v37  ;;  %v1046_v62 = vpop.permute.xlu1 %1045 }
 0x44d   : > { %v1047_v33 = vsel %vm553_vm11, %v2606_v20, %v1046_v62  ;;  %v1050_v43 = vsel %vm553_vm11, %v1046_v62, %v2602_v59  ;;  %vm1243_vm11 = vcmask 1041408  }
 0x44e   : > { %1107 = vst [vmem:[#allocation2 + $0x30] sm:$0x33] %v1647_v44  ;;  %v1053_v49 = vmul.f32 %v2398_v54, %v1047_v33  ;;  %v1054_v38 = vmul.f32 %v2403_v26, %v1050_v43  ;;  %v1150_v54 = vpop.permute.xlu0 %1149 }
 0x450   : > { %v1646_v39 = vpack.c.bf16 %v1054_v38, %v1053_v49  ;;  %v1082_v19 = vpop.permute.xlu1 %1081 }
 0x451   : > { %v1083_v23 = vsel %vm2836_vm3, %v1080_v18, %v1082_v19  ;;  %v1086_v56 = vsel %vm2837_vm12, %v1082_v19, %v2630_v40  ;;  %v1727_v20 = vld [vmem:[#allocation2 + $0x8] ss:$16 sps:$4 sm:$0xff]   ;;  %v1729_v48 = vld [vmem:[#allocation2 + $0xc] ss:$16 sps:$4 sm:$0xff]  }
 0x452   : > { %v1070_v57 = vrot.slane %v1646_v39, 6  ;;  %v1089_v59 = vmul.f32 %v2408_v63, %v1083_v23  ;;  %v1090_v30 = vmul.f32 %v2411_v1, %v1086_v56  ;;  %1297 = vmatprep.subr.bf16.mxu1 %v1729_v48 }
 0x453   : > { %1298 = vmatpush1.bf16.msra.mxu1 %v1727_v20 }
 0x454   : > { %1074 = vst [vmem:[#allocation2 + $0x28] sm:$0xcc] %v1070_v57  ;;  %v1648_v26 = vpack.c.bf16 %v1090_v30, %v1089_v59  ;;  %v1148_v32 = vpop.permute.xlu1 %1147 }
 0x455   : > { %v1154_v18 = vsel %vm664_vm13, %v1148_v32, %v1150_v54  ;;  %v1155_v29 = vsel %vm664_vm13, %v1146_v17, %v1148_v32  ;;  %v1730_v40 = vld [vmem:[#allocation2 + $0x20] ss:$16 sps:$4 sm:$0xff]   ;;  %v1732_v3 = vld [vmem:[#allocation2 + $0x24] ss:$16 sps:$4 sm:$0xff]  }
 0x456   : > { %1108 = vst [vmem:[#allocation2 + $0x38] sm:$0x33] %v1648_v26  ;;  %v1157_v41 = vmul.f32 %v2503_v51, %v1155_v29  ;;  %v1158_v63 = vmul.f32 %v2510_v42, %v1154_v18  ;;  %1258 = vmatprep.subr.bf16.mxu0 %v1732_v3 }
 0x457   : > { %1259 = vmatpush1.bf16.msra.mxu0 %v1730_v40 }
 0x458   : > { %v1651_v1 = vpack.c.bf16 %v1158_v63, %v1157_v41  ;;  %v1152_v22 = vpop.permute.xlu1 %1151  ;;  %v1745_v41 = vld [vmem:[%s1996_s25] sm:$0xff]  ;;  %s1653_s25 = sshll.u32 %s1908_s22, 8  ;;  %s1422_s22 = scalar_lea.sflag [#allocation5], %s1992_s13 }
 0x459   : > { %v1153_v47 = vsel %vm664_vm13, %v1150_v54, %v1152_v22  ;;  %v1156_v36 = vsel %vm664_vm13, %v1152_v22, %v1146_v17  ;;  %vm1239_vm13 = vcmask 293888   ;;  %v1396_v63 = vcombine.low %v1745_v41, %v1745_v41  ;;  %s2729_s8 = scalar_lea.hbm %s2778_s5, %s1653_s25 }
 0x45a   : > { %1177 = vst [vmem:[#allocation2 + $0x40] sm:$0x33] %v1651_v1  ;;  %v1159_v34 = vmul.f32 %v2513_v53, %v1153_v47  ;;  %v1160_v50 = vmul.f32 %v2516_v6, %v1156_v36 }
 0x45b   : > { %v1403_v1 = vrot.slane %v1396_v63, %v2002_v5 }
 0x45c   : > { %v1652_v60 = vpack.c.bf16 %v1160_v50, %v1159_v34 }
 0x45d   : > { %v1733_v61 = vld [vmem:[#allocation2 + $0x28] ss:$16 sps:$4 sm:$0xff]   ;;  %v1735_v51 = vld [vmem:[#allocation2 + $0x2c] ss:$16 sps:$4 sm:$0xff]  }
 0x45e   : > { %1178 = vst [vmem:[#allocation2 + $0x48] sm:$0x33] %v1652_v60  ;;  %1299 = vmatprep.subr.bf16.mxu1 %v1735_v51  ;;  %v1404_v60 = vcombine.high %v1403_v1, %v1403_v1 }
 0x45f   : > { %1300 = vmatpush1.bf16.msra.mxu1 %v1733_v61 }
 0x461   : > { %v1187_v42 = vld [vmem:[#allocation2 + $0x40] sm:$0x33] }
 0x462   : > { %v1604_v52 = vcombine.high %v1187_v42, %v1187_v42  ;;  %v1603_v0 = vcombine.low %v1187_v42, %v1187_v42 }
 0x464   : > { %1607 = vmatprep.subr.msk.bf16.mxu0 %vm1243_vm11, %v1604_v52  ;;  %v1245_v4 = vsel %vm1243_vm11, %v1603_v0, 0 }
 0x465   : > { %1261 = vmatpush1.bf16.msra.mxu0 %v1245_v4  ;;  %v1188_v53 = vld [vmem:[#allocation2 + $0x48] sm:$0x33] }
 0x466   : > { %v1606_v6 = vcombine.high %v1188_v53, %v1188_v53  ;;  %v1605_v25 = vcombine.low %v1188_v53, %v1188_v53 }
 0x468   : > { %1608 = vmatmul.mubr.msk.bf16.vlgmr.msra.gmra.mrb[4].mxu0 %vm1239_vm13, %v880_v15  ;;  %1609 = vmatprep.subr.msk.bf16.mxu1 %vm1243_vm11, %v1606_v6  ;;  %v1251_v16 = vsel %vm1243_vm11, %v1605_v25, 0 }
 0x469   : > { %1302 = vmatpush1.bf16.msra.mxu1 %v1251_v16 }
 0x46c   : > { %1610 = vmatmul.mubr.msk.bf16.vlgmr.msra.gmra.mrb[4].mxu1 %vm1239_vm13, %v880_v15 }
 0x53b   : > { %v1290_v13 = vpop.f32.mrb[4].mxu0 }
 0x53c   : > { %v1338_v21 = vsel %vm826_vm0, %v1290_v13, 0.0  ;;  %v1292_v35 = vpop.f32.mrb[5].mxu0 }
 0x53d   : > { %v1339_v2 = vsel %vm826_vm0, %v1292_v35, 0.0  ;;  %v1294_v31 = vpop.f32.mrb[6].mxu0 }
 0x53e   : > { %v1340_v55 = vadd.f32 %v1339_v2, %v1338_v21  ;;  %v1295_v45 = vpop.f32.mrb[7].mxu0 }
 0x53f   : > { %v1331_v24 = vpop.f32.mrb[4].mxu1 }
 0x540   : > { %v1341_v46 = vsel %vm826_vm0, %v1331_v24, 0.0  ;;  %v1333_v8 = vpop.f32.mrb[5].mxu1 }
 0x541   : > { %v1342_v58 = vadd.f32 %v1341_v46, %v1340_v55  ;;  %v1343_v28 = vsel %vm826_vm0, %v1333_v8, 0.0  ;;  %v1335_v37 = vpop.f32.mrb[6].mxu1 }
 0x542   : > { %v1336_v12 = vpop.f32.mrb[7].mxu1 }
 0x543   : > { %v1344_v44 = vadd.f32 %v1343_v28, %v1342_v58 }
 0x545   : > { %1345 = vadd.xlane.f32.xlu0 %v1344_v44 }
 0x5d2   : > { %v1346_v62 = vpop.xlane.xlu0 %1345 }
 0x5d3   : > { %v1347_v33 = vmul.f32 0.001953125, %v1346_v62 }
 0x5d5   : > { %v1348_v43 = vsub.f32 %v1290_v13, %v1347_v33  ;;  %v1349_v17 = vsub.f32 %v1292_v35, %v1347_v33  ;;  %v1350_v49 = vsub.f32 %v1331_v24, %v1347_v33  ;;  %v1351_v38 = vsub.f32 %v1333_v8, %v1347_v33 }
 0x5d7   : > { %v1352_v39 = vmul.f32 %v1348_v43, %v1348_v43  ;;  %v1353_v19 = vmul.f32 %v1349_v17, %v1349_v17  ;;  %v1354_v23 = vmul.f32 %v1350_v49, %v1350_v49  ;;  %v1355_v56 = vmul.f32 %v1351_v38, %v1351_v38 }
 0x5d9   : > { %v1356_v20 = vsel %vm826_vm0, %v1352_v39, 0.0  ;;  %v1357_v48 = vsel %vm826_vm0, %v1353_v19, 0.0  ;;  %v1359_v59 = vsel %vm826_vm0, %v1354_v23, 0.0  ;;  %v1361_v54 = vsel %vm826_vm0, %v1355_v56, 0.0 }
 0x5da   : > { %v1358_v57 = vadd.f32 %v1357_v48, %v1356_v20 }
 0x5dc   : > { %v1360_v30 = vadd.f32 %v1359_v59, %v1358_v57 }
 0x5de   : > { %v1362_v26 = vadd.f32 %v1361_v54, %v1360_v30 }
 0x5e0   : > { %1363 = vadd.xlane.f32.xlu1 %v1362_v26 }
 0x66d   : > { %v1364_v32 = vpop.xlane.xlu1 %1363 }
 0x66e   : > { %v1365_v18 = vmul.f32 0.001953125, %v1364_v32 }
 0x670   : > { %v1366_v29 = vadd.f32 1e-05, %v1365_v18 }
 0x672   : > { %1743 = vrsqrt.f32 %v1366_v29 }
 0x67c   : > { %v1744_v40 = vpop.eup %1743 }
 0x67d   : > { %v1368_v3 = vmul.f32 %v1744_v40, %v2547_v27 }
 0x67f   : > { %1371 = vperm.xlu0 %1711, %v1368_v3  }
 0x6fe   : > { %v1372_v22 = vpop.permute.xlu0 %1371 }
 0x6ff   : > { %v1374_v47 = vmul.f32 %v1372_v22, %v1348_v43  ;;  %v1375_v36 = vmul.f32 %v1372_v22, %v1349_v17  ;;  %v1376_v34 = vmul.f32 %v1372_v22, %v1350_v49  ;;  %v1377_v50 = vmul.f32 %v1372_v22, %v1351_v38 }
 0x701   : > { %v1378_v61 = vadd.f32 %v1374_v47, %v2550_v14  ;;  %v1379_v51 = vadd.f32 %v1375_v36, %v2550_v14  ;;  %v1380_v42 = vadd.f32 %v1376_v34, %v2550_v14  ;;  %v1381_v27 = vadd.f32 %v1377_v50, %v2550_v14 }
 0x703   : > { %v1382_v52 = vadd.f32 %v1378_v61, %v2006_v7  ;;  %v1383_v5 = vadd.f32 %v1379_v51, %v2017_v10  ;;  %v1384_v0 = vadd.f32 %v1380_v42, %v2011_v9  ;;  %v1385_v4 = vadd.f32 %v1381_v27, %v2025_v11 }
 0x704   : > { %v1407_v15 = vadd.f32 %v1403_v1, %v1378_v61  ;;  %v1408_v53 = vadd.f32 %v1404_v60, %v1379_v51  ;;  %v1409_v6 = vadd.f32 %v1380_v42, %v2006_v7  ;;  %v1410_v25 = vadd.f32 %v1381_v27, %v2017_v10 }
 0x705   : > { %v1390_v14 = vcombine.low %v1382_v52, %v1383_v5  ;;  %v1391_v16 = vcombine.low %v1384_v0, %v1385_v4 }
 0x706   : > { %v1415_v13 = vcombine.low %v1407_v15, %v1408_v53  ;;  %v1416_v21 = vcombine.low %v1409_v6, %v1410_v25 }
 0x707   : > { %1394 = vst [vmem:[%s240_s15] sm:$0x33] %v1390_v14  ;;  %1395 = vst [vmem:[%s240_s15 + $0x8] sm:$0x33] %v1391_v16 }
 0x708   : > { %1419 = vst [vmem:[%s240_s15] sm:$0xcc] %v1415_v13  ;;  %1420 = vst [vmem:[%s240_s15 + $0x8] sm:$0xcc] %v1416_v21 }
 0x709   : > { %1789 = shalt.err (!%p1786_p4)
}
 0x70a   : > { %s1790_s13 = scalar_lea.hbm %s2729_s8, 256  ;;  %s1794_s12 = scalar_lea.hbm %s2778_s5, 512 }
 0x70b   : > { %p1791_p5 = scmp.ne.s32.totalorder %s2729_s8, %s1790_s13  ;;  %p1795_p0 = scmp.lt.u32.totalorder %s2729_s8, %s2778_s5 }
 0x70c   : > { %p1796_p1 = scmp.lt.u32.totalorder %s1794_s12, %s1790_s13  ;;  %p1798_p6 = scmp.lt.u32.totalorder %s1790_s13, %s2729_s8 }
 0x70d   : > { %p1792_p8 = pnand %p1791_p5, %p2838_p11 }
 0x70e   : > { %p1797_p3 = por %p1796_p1, %p1795_p0 }
 0x70f   : > { %p1793_p9 = pneg %p1792_p8 }
 0x710   : > { %p1799_p12 = por %p1798_p6, %p1797_p3 }
 0x712   : > { %p1800_p13 = pnand %p1799_p12, %p1793_p9 }
 0x714   : > { %1803 = shalt.err (!%p1800_p13)
}
 0x715   : > { %1656 = dma.vmem_to_hbm [thread:$0]  (%p2838_p11), %s2731_s16, 256, %s2729_s8, %s1422_s22  }
 0x716 PF: > { %s1448_s25 = sand.u32 1, %s1830_s18   ;;  %p2839_p7 = scmp.ne.s32.totalorder %s2789_s6, 0 }
 0x717   : > { %p2840_p10 = scmp.ge.s32.totalorder %s1842_s21, 2  ;;  %s1449_s15 = scalar_lea.sflag [#allocation5], %s1448_s25 }
 0x719   : > { %p1663_p2 = pnand %p2840_p10, %p2839_p7 }
 0x71b   : > { %1825 = dma.done.wait (!%p1663_p2), %s1449_s15, 256  }
 0x71c   : > { %1827 = vsyncadd (!%p1663_p2), %s1449_s15, 4294967040  ;;  %p18_p4 = scmp.ge.s32.totalorder %s1912_s24, 4   ;;  %s2841_s18 = smov %s1834_s19 }
 0x71d   : > { %s2842_s19 = smov %s1838_s20  ;;  %s2843_s20 = smov %s1924_s27 }
 0x71e   : > { %s2844_s21 = smov %s1912_s24  ;;  %20 = sbr.rel (!%p18_p4) target bundleno = 5 (0x5), region = 85 }
 0x725   :  { %1454 = vsyncpa [#allocation4], 1 }
 0x726   :  { %1456 = vsyncpa [#allocation4 + $0x1], 1 }
 0x727   :  { %1457 = vsyncpa [#allocation5], 1 }
 0x728   :  { %1459 = vsyncpa [#allocation5 + $0x1], 1 }

</bundles_post_ra>
